<compile_context>
chip_gen: v7x
topology: tpu7x:2x2x1
jax: 0.10.0
libtpu: 0.0.40
codegen_flags: <defaults>
</compile_context>

<pallas_src>
import functools

import numpy as np
import jax
import jax.numpy as jnp
from jax import lax
from jax.experimental import pallas as pl
from jax.experimental.pallas import tpu as pltpu

EPS = 1e-5        # nn.InstanceNorm1d default eps
MASK_NEG = 1e9    # large finite negative bias (equivalent to -inf for non-degenerate masks)
_MIB = 1024 * 1024


# ----------------------------------------------------------------------------
# TPU-generation-dependent knobs
# ----------------------------------------------------------------------------
def _tpu_vmem_capacity():
    try:
        return int(pltpu.get_tpu_info().vmem_capacity_bytes)
    except Exception:
        pass
    try:
        kind = jax.devices()[0].device_kind.lower()
    except Exception:
        kind = ""
    if "v2" in kind or "v3" in kind:
        return 16 * _MIB
    if "v7" in kind or "7x" in kind:
        return 64 * _MIB
    return 128 * _MIB        # v4 / v5e / v6e


def _vmem_limit_bytes(cap):
    # leave headroom for compiler internal scratch, semaphores and double-buffered windows
    return int(min(max(cap - 16 * _MIB, cap // 2), 112 * _MIB))


def _softmax_exp_dtype():
    # bf16 EUP exp is the fast path on v6e/v7x; v5e and older have no native bf16 VPU/EUP.
    try:
        kind = jax.devices()[0].device_kind.lower()
    except Exception:
        return jnp.float32
    if any(t in kind for t in ("v2", "v3", "v4", "v5")):
        return jnp.float32
    return jnp.bfloat16


def _pick_kv_tile(M, cap):
    target = 512 if cap <= 64 * _MIB else 1024
    if M <= target:
        return M
    for t in (target, 512, 256, 128):
        if M % t == 0:
            return t
    # TODO(synk): pad the key/value axis to a multiple of 128 for ragged M instead of
    # falling back to a single (possibly VMEM-heavy) tile.
    return M


# ----------------------------------------------------------------------------
# Pallas kernel: one AttentionalPropagation layer, one (batch, kv-tile) grid step
# ----------------------------------------------------------------------------
def _attn_prop_kernel(src_idx_ref,                    # scalar-prefetch (SMEM); used by index_maps only
                      x_ref, src_ref, mask_ref,
                      wq_ref, bq_ref, wk_ref, bk_ref, wv_ref, bv_ref,
                      wm_ref, bm_ref,
                      w1a_ref, w1b_ref, b1_ref, w2_ref, b2_ref,
                      out_ref,
                      q_sc, m_sc, l_sc, acc_sc,
                      *, num_heads, exp_dtype):
    del src_idx_ref
    kv = pl.program_id(1)
    D = x_ref.shape[-1]
    hd = D // num_heads

    # ---- first KV tile: project queries once, reset online-softmax state ----
    @pl.when(kv == 0)
    def _():
        x_bf = x_ref[0].astype(jnp.bfloat16)
        q = jnp.dot(x_bf, wq_ref[...], preferred_element_type=jnp.float32) + bq_ref[...]
        q_sc[...] = q.astype(jnp.bfloat16)
        m_sc[...] = jnp.full_like(m_sc, -jnp.inf)
        l_sc[...] = jnp.zeros_like(l_sc)
        acc_sc[...] = jnp.zeros_like(acc_sc)

    # ---- every KV tile: K/V projections + flash-style online-softmax update ----
    src_bf = src_ref[0].astype(jnp.bfloat16)                                  # (TM, D)
    k = (jnp.dot(src_bf, wk_ref[...], preferred_element_type=jnp.float32)
         + bk_ref[...]).astype(jnp.bfloat16)
    v = (jnp.dot(src_bf, wv_ref[...], preferred_element_type=jnp.float32)
         + bv_ref[...]).astype(jnp.bfloat16)
    # additive mask bias computed once per tile (mask arrives as int8 {0, 1})
    bias = (mask_ref[0].astype(jnp.float32) - 1.0) * MASK_NEG                 # (N, TM)

    q = q_sc[...]                                                             # (N, D) bf16
    contract_last = (((1,), (1,)), ((), ()))      # q_h (N,hd) x k_h (TM,hd) -> (N, TM)
    for h in range(num_heads):                    # static, unrolled (H = 4)
        sl = slice(h * hd, (h + 1) * hd)
        s = lax.dot_general(q[:, sl], k[:, sl], contract_last,
                            preferred_element_type=jnp.float32) + bias        # (N, TM) f32
        m_prev = m_sc[:, h:h + 1]                                              # (N, 1)
        m_new = jnp.maximum(m_prev, jnp.max(s, axis=-1, keepdims=True))
        alpha = jnp.exp(m_prev - m_new)
        p = jnp.exp((s - m_new).astype(exp_dtype))                             # bf16 on v6e/v7x
        l_sc[:, h:h + 1] = alpha * l_sc[:, h:h + 1] + jnp.sum(
            p.astype(jnp.float32), axis=-1, keepdims=True)
        acc_sc[:, sl] = alpha * acc_sc[:, sl] + jnp.dot(
            p.astype(jnp.bfloat16), v[:, sl], preferred_element_type=jnp.float32)
        m_sc[:, h:h + 1] = m_new

    # ---- last KV tile: per-head merge, MLP (InstanceNorm1d + ReLU), residual ----
    @pl.when(kv == pl.num_programs(1) - 1)
    def _():
        x = x_ref[0]                                                           # (N, D) f32
        # merge conv folded into the head loop (no head concat / lane relayout)
        msg = None
        for h in range(num_heads):
            sl = slice(h * hd, (h + 1) * hd)
            inv = pl.reciprocal(l_sc[:, h:h + 1], approx=True)
            o_h = (acc_sc[:, sl] * inv).astype(jnp.bfloat16)                   # (N, hd)
            t = jnp.dot(o_h, wm_ref[sl, :], preferred_element_type=jnp.float32)
            msg = t if msg is None else msg + t
        message = msg + bm_ref[...]                                            # (N, D) f32

        # MLP([2D, 2D, D]) on concat([x, message], channel): concat folded into split W1.
        h1 = (jnp.dot(x.astype(jnp.bfloat16), w1a_ref[...],
                      preferred_element_type=jnp.float32)
              + jnp.dot(message.astype(jnp.bfloat16), w1b_ref[...],
                        preferred_element_type=jnp.float32)
              + b1_ref[...])                                                   # (N, 2D) f32
        # InstanceNorm1d (affine=False): normalize each channel over the spatial axis.
        mu = jnp.mean(h1, axis=0, keepdims=True)
        var = jnp.mean((h1 - mu) ** 2, axis=0, keepdims=True)
        h1 = jnp.maximum((h1 - mu) * lax.rsqrt(var + EPS), 0.0)                # ReLU
        delta = (jnp.dot(h1.astype(jnp.bfloat16), w2_ref[...],
                         preferred_element_type=jnp.float32) + b2_ref[...])    # (N, D)
        out_ref[0] = x + delta                                                 # residual, f32


# ----------------------------------------------------------------------------
# Weight pre-arrangement (per layer): permute heads contiguous, fold scale, cast bf16
# ----------------------------------------------------------------------------
def _prep_weights(p, D, num_heads):
    hd = D // num_heads
    # torch channel c of the q/k/v projections belongs to head c % H with per-head
    # feature index c // H.  New order: perm[h*hd + d] = d*H + h  (head-contiguous).
    perm = np.arange(D).reshape(hd, num_heads).T.reshape(-1)
    scale = 1.0 / (hd ** 0.5)

    wq_t = (p['wq'][perm, :] * scale).T.astype(jnp.bfloat16)   # (D, D)  (in, out)
    wk_t = p['wk'][perm, :].T.astype(jnp.bfloat16)
    wv_t = p['wv'][perm, :].T.astype(jnp.bfloat16)
    wm_t = p['wm'][:, perm].T.astype(jnp.bfloat16)             # rows = permuted inputs
    w1_t = p['w1'].T                                           # (2D, 2D)
    w1a_t = w1_t[:D].astype(jnp.bfloat16)                      # acts on x
    w1b_t = w1_t[D:].astype(jnp.bfloat16)                      # acts on message
    w2_t = p['w2'].T.astype(jnp.bfloat16)                      # (2D, D)

    bq = (p['bq'][perm] * scale).reshape(1, D).astype(jnp.float32)
    bk = p['bk'][perm].reshape(1, D).astype(jnp.float32)
    bv = p['bv'][perm].reshape(1, D).astype(jnp.float32)
    bm = p['bm'].reshape(1, D).astype(jnp.float32)
    b1 = p['b1'].reshape(1, 2 * D).astype(jnp.float32)
    b2 = p['b2'].reshape(1, D).astype(jnp.float32)

    return (wq_t, bq, wk_t, bk, wv_t, bv, wm_t, bm, w1a_t, w1b_t, b1, w2_t, b2)


# ----------------------------------------------------------------------------
# Wrapper: one AttentionalPropagation layer over the stacked (2B, N, D) state
# ----------------------------------------------------------------------------
def attentional_propagation(desc, src_idx, mask_i8, wts, num_heads):
    BB, N, D = desc.shape
    M = mask_i8.shape[-1]                       # == N (src is the same stacked state)

    cap = _tpu_vmem_capacity()
    TM = _pick_kv_tile(M, cap)
    num_kv = M // TM
    exp_dtype = _softmax_exp_dtype()

    def w_spec(a):
        return pl.BlockSpec(a.shape, lambda b, m, sidx: (0,) * a.ndim)

    in_specs = [
        pl.BlockSpec((1, N, D), lambda b, m, sidx: (b, 0, 0)),           # x (resident over kv)
        pl.BlockSpec((1, TM, D), lambda b, m, sidx: (sidx[b], m, 0)),    # src tile (table-gathered)
        pl.BlockSpec((1, N, TM), lambda b, m, sidx: (b, 0, m)),          # mask tile (int8)
    ] + [w_spec(a) for a in wts]

    return pl.pallas_call(
        functools.partial(_attn_prop_kernel, num_heads=num_heads, exp_dtype=exp_dtype),
        out_shape=jax.ShapeDtypeStruct((BB, N, D), jnp.float32),
        grid_spec=pltpu.PrefetchScalarGridSpec(
            num_scalar_prefetch=1,
            grid=(BB, num_kv),
            in_specs=in_specs,
            out_specs=pl.BlockSpec((1, N, D), lambda b, m, sidx: (b, 0, 0)),
            scratch_shapes=[
                pltpu.VMEM((N, D), jnp.bfloat16),              # q (head-contiguous)
                pltpu.VMEM((N, num_heads), jnp.float32),       # running max per head
                pltpu.VMEM((N, num_heads), jnp.float32),       # running softmax denom per head
                pltpu.VMEM((N, D), jnp.float32),               # rescaled P@V accumulator
            ],
        ),
        compiler_params=pltpu.CompilerParams(
            dimension_semantics=("parallel", "arbitrary"),
            vmem_limit_bytes=_vmem_limit_bytes(cap),
        ),
    )(src_idx, desc, desc, mask_i8, *wts)


# ----------------------------------------------------------------------------
# AttentionalGNN forward (PyTorch layout at the boundary: desc (B, D, N))
# ----------------------------------------------------------------------------
def attentional_gnn(desc0, desc1, mask00, mask11, mask01, mask10,
                    layer_params, layer_names, num_heads=4):
    # NOTE: `layer.attn.prob = []` in the torch module is a dead side effect
    # (prob is never returned), so it is not reproduced.
    # TODO(synk): the stacked-batch formulation (like the original kernel) requires
    # desc0/desc1 to share the same keypoint count.
    d0 = jnp.transpose(desc0, (0, 2, 1)).astype(jnp.float32)   # (B, N, D)
    d1 = jnp.transpose(desc1, (0, 2, 1)).astype(jnp.float32)
    B, N, D = d0.shape

    # layer-invariant inputs, hoisted out of the layer loop (built exactly once):
    desc = jnp.concatenate([d0, d1], axis=0)                   # stacked state (2B, N, D)
    to_i8 = lambda m: (m != 0).astype(jnp.int8)
    m_self = jnp.concatenate([to_i8(mask00), to_i8(mask11)], axis=0)
    m_cross = jnp.concatenate([to_i8(mask01), to_i8(mask10)], axis=0)
    idx_self = jnp.arange(2 * B, dtype=jnp.int32)
    idx_cross = jnp.concatenate([jnp.arange(B, 2 * B, dtype=jnp.int32),
                                 jnp.arange(0, B, dtype=jnp.int32)])

    for p, name in zip(layer_params, layer_names):
        wts = _prep_weights(p, D, num_heads)
        if name == 'cross':
            src_idx, mask = idx_cross, m_cross
        else:
            src_idx, mask = idx_self, m_self
        desc = attentional_propagation(desc, src_idx, mask, wts, num_heads)

    d0, d1 = desc[:B], desc[B:]
    return jnp.transpose(d0, (0, 2, 1)), jnp.transpose(d1, (0, 2, 1))


# ----------------------------------------------------------------------------
# Pure-JAX reference (mirrors the torch code) used only for self-checking.
# bf16=True quantizes matmul inputs through bf16; exp_bf16=True additionally mirrors the
# kernel's bf16 softmax exponent path (used on v6e/v7x).
# ----------------------------------------------------------------------------
def _ref_prop(x, src, mask, p, H, bf16=False, exp_bf16=False):
    B, N, D = x.shape
    dim = D // H
    qz = lambda a: a.astype(jnp.bfloat16).astype(jnp.float32)
    c = qz if bf16 else (lambda a: a)
    ce = qz if exp_bf16 else (lambda a: a)

    def conv(z, w, b):  # 1x1 conv, channels-last
        return jnp.einsum('bnc,oc->bno', c(z), c(w)) + b

    q = conv(x, p['wq'], p['bq']).reshape(B, N, dim, H)
    k = conv(src, p['wk'], p['bk']).reshape(B, -1, dim, H)
    v = conv(src, p['wv'], p['bv']).reshape(B, -1, dim, H)
    scores = jnp.einsum('bndh,bmdh->bhnm', c(q), c(k)) / (dim ** 0.5)
    scores = jnp.where(mask[:, None] == 0, -jnp.inf, scores)
    smax = jnp.max(scores, axis=-1, keepdims=True)
    pexp = ce(jnp.exp(ce(scores - smax)))
    prob = pexp / jnp.sum(pexp, axis=-1, keepdims=True)
    o = jnp.einsum('bhnm,bmdh->bndh', c(prob), c(v)).reshape(B, N, D)
    msg = conv(o, p['wm'], p['bm'])
    h1 = conv(jnp.concatenate([x, msg], axis=-1), p['w1'], p['b1'])
    mu = h1.mean(axis=1, keepdims=True)
    var = ((h1 - mu) ** 2).mean(axis=1, keepdims=True)
    h1 = jnp.maximum((h1 - mu) / jnp.sqrt(var + EPS), 0.0)
    return x + conv(h1, p['w2'], p['b2'])


def reference_gnn(desc0, desc1, mask00, mask11, mask01, mask10,
                  layer_params, layer_names, H=4, bf16=False, exp_bf16=False):
    d0 = jnp.transpose(desc0, (0, 2, 1)).astype(jnp.float32)
    d1 = jnp.transpose(desc1, (0, 2, 1)).astype(jnp.float32)
    for p, name in zip(layer_params, layer_names):
        if name == 'cross':
            src0, src1, m0, m1 = d1, d0, mask01, mask10
        else:
            src0, src1, m0, m1 = d0, d1, mask00, mask11
        d0, d1 = (_ref_prop(d0, src0, m0, p, H, bf16, exp_bf16),
                  _ref_prop(d1, src1, m1, p, H, bf16, exp_bf16))
    return jnp.transpose(d0, (0, 2, 1)), jnp.transpose(d1, (0, 2, 1))


# ----------------------------------------------------------------------------
# Deterministic parameter init (shapes from the torch __init__)
# ----------------------------------------------------------------------------
def init_layer_params(key, D):
    keys = jax.random.split(key, 6)

    def conv(k, out_c, in_c, zero_bias=False):
        kw, kb = jax.random.split(k)
        w = jax.random.normal(kw, (out_c, in_c), jnp.float32) / jnp.sqrt(in_c)
        b = (jnp.zeros((out_c,), jnp.float32) if zero_bias
             else 0.1 * jax.random.normal(kb, (out_c,), jnp.float32))
        return w, b

    wq, bq = conv(keys[0], D, D)
    wk, bk = conv(keys[1], D, D)
    wv, bv = conv(keys[2], D, D)
    wm, bm = conv(keys[3], D, D)
    w1, b1 = conv(keys[4], 2 * D, 2 * D)
    w2, b2 = conv(keys[5], D, 2 * D, zero_bias=True)  # nn.init.constant_(mlp[-1].bias, 0.)
    return dict(wq=wq, bq=bq, wk=wk, bk=bk, wv=wv, bv=bv, wm=wm, bm=bm,
                w1=w1, b1=b1, w2=w2, b2=b2)


if __name__ == "__main__":
    B, D, N, H = 2, 32, 16, 4                # feature_dim=32, 4 heads, 16 keypoints
    layer_names = ['self', 'cross']

    key = jax.random.PRNGKey(0)
    k_d0, k_d1, k_m, k_p = jax.random.split(key, 4)
    desc0 = jax.random.normal(k_d0, (B, D, N), jnp.float32)
    desc1 = jax.random.normal(k_d1, (B, D, N), jnp.float32)

    def make_mask(k):
        m = (jax.random.uniform(k, (B, N, N)) > 0.3).astype(jnp.float32)
        return m.at[:, :, 0].set(1.0)        # keep every query row attendable

    mask00, mask11, mask01, mask10 = [make_mask(k) for k in jax.random.split(k_m, 4)]
    layer_params = [init_layer_params(k, D)
                    for k in jax.random.split(k_p, len(layer_names))]

    out0, out1 = attentional_gnn(desc0, desc1, mask00, mask11, mask01, mask10,
                                 layer_params, layer_names, num_heads=H)
    jax.block_until_ready((out0, out1))
    assert out0.shape == (B, D, N) and out1.shape == (B, D, N)

    # tight check vs. a reference that mirrors the kernel's MXU/softmax dtypes
    exp_bf16 = (_softmax_exp_dtype() == jnp.bfloat16)
    refq0, refq1 = reference_gnn(desc0, desc1, mask00, mask11, mask01, mask10,
                                 layer_params, layer_names, H=H,
                                 bf16=True, exp_bf16=exp_bf16)
    assert jnp.allclose(out0, refq0, atol=5e-2, rtol=5e-2), "desc0 mismatch (bf16 ref)"
    assert jnp.allclose(out1, refq1, atol=5e-2, rtol=5e-2), "desc1 mismatch (bf16 ref)"

    # loose sanity check vs. full-f32 torch-mirroring reference
    reff0, reff1 = reference_gnn(desc0, desc1, mask00, mask11, mask01, mask10,
                                 layer_params, layer_names, H=H, bf16=False)
    assert jnp.allclose(out0, reff0, atol=2e-1, rtol=1e-1), "desc0 mismatch (f32 ref)"
    assert jnp.allclose(out1, reff1, atol=2e-1, rtol=1e-1), "desc1 mismatch (f32 ref)"
    print("KERNEL_OK")
</pallas_src>

<mosaic_0001>
module attributes {stable_mosaic.version = 11 : i64} {
  func.func @_attn_prop_kernel(%arg0: i32, %arg1: i32, %arg2: memref<4xi32, #tpu.memory_space<smem>>, %arg3: memref<1x16x32xf32, #tpu.memory_space<vmem>>, %arg4: memref<1x16x32xf32, #tpu.memory_space<vmem>>, %arg5: memref<1x16x16xi8, #tpu.memory_space<vmem>>, %arg6: memref<32x32xbf16, #tpu.memory_space<vmem>>, %arg7: memref<1x32xf32, #tpu.memory_space<vmem>>, %arg8: memref<32x32xbf16, #tpu.memory_space<vmem>>, %arg9: memref<1x32xf32, #tpu.memory_space<vmem>>, %arg10: memref<32x32xbf16, #tpu.memory_space<vmem>>, %arg11: memref<1x32xf32, #tpu.memory_space<vmem>>, %arg12: memref<32x32xbf16, #tpu.memory_space<vmem>>, %arg13: memref<1x32xf32, #tpu.memory_space<vmem>>, %arg14: memref<32x64xbf16, #tpu.memory_space<vmem>>, %arg15: memref<32x64xbf16, #tpu.memory_space<vmem>>, %arg16: memref<1x64xf32, #tpu.memory_space<vmem>>, %arg17: memref<64x32xbf16, #tpu.memory_space<vmem>>, %arg18: memref<1x32xf32, #tpu.memory_space<vmem>>, %arg19: memref<1x16x32xf32, #tpu.memory_space<vmem>>, %arg20: memref<16x32xbf16, #tpu.memory_space<vmem>>, %arg21: memref<16x4xf32, #tpu.memory_space<vmem>>, %arg22: memref<16x4xf32, #tpu.memory_space<vmem>>, %arg23: memref<16x32xf32, #tpu.memory_space<vmem>>) attributes {dimension_semantics = [#tpu.dimension_semantics<parallel>, #tpu.dimension_semantics<arbitrary>], iteration_bounds = array<i64: 4, 1>, scalar_prefetch = 1 : i64, scratch_operands = 4 : i64, tpu.core_type = #tpu.core_type<tc>, window_params = [{transform_indices = @transform_0, window_bounds = array<i64: 1, 16, 32>}, {transform_indices = @transform_1, window_bounds = array<i64: 1, 16, 32>}, {transform_indices = @transform_2, window_bounds = array<i64: 1, 16, 16>}, {pipeline_mode = #tpu.pipeline_mode<synchronous>, transform_indices = @transform_3, window_bounds = array<i64: 32, 32>}, {pipeline_mode = #tpu.pipeline_mode<synchronous>, transform_indices = @transform_4, window_bounds = array<i64: 1, 32>}, {pipeline_mode = #tpu.pipeline_mode<synchronous>, transform_indices = @transform_5, window_bounds = array<i64: 32, 32>}, {pipeline_mode = #tpu.pipeline_mode<synchronous>, transform_indices = @transform_6, window_bounds = array<i64: 1, 32>}, {pipeline_mode = #tpu.pipeline_mode<synchronous>, transform_indices = @transform_7, window_bounds = array<i64: 32, 32>}, {pipeline_mode = #tpu.pipeline_mode<synchronous>, transform_indices = @transform_8, window_bounds = array<i64: 1, 32>}, {pipeline_mode = #tpu.pipeline_mode<synchronous>, transform_indices = @transform_9, window_bounds = array<i64: 32, 32>}, {pipeline_mode = #tpu.pipeline_mode<synchronous>, transform_indices = @transform_10, window_bounds = array<i64: 1, 32>}, {pipeline_mode = #tpu.pipeline_mode<synchronous>, transform_indices = @transform_11, window_bounds = array<i64: 32, 64>}, {pipeline_mode = #tpu.pipeline_mode<synchronous>, transform_indices = @transform_12, window_bounds = array<i64: 32, 64>}, {pipeline_mode = #tpu.pipeline_mode<synchronous>, transform_indices = @transform_13, window_bounds = array<i64: 1, 64>}, {pipeline_mode = #tpu.pipeline_mode<synchronous>, transform_indices = @transform_14, window_bounds = array<i64: 64, 32>}, {pipeline_mode = #tpu.pipeline_mode<synchronous>, transform_indices = @transform_15, window_bounds = array<i64: 1, 32>}, {transform_indices = @transform_16, window_bounds = array<i64: 1, 16, 32>}]} {
    %c0_i32 = arith.constant 0 : i32
    %0 = arith.cmpi eq, %arg1, %c0_i32 : i32
    %1 = arith.extui %0 : i1 to i32
    %c0_i32_0 = arith.constant 0 : i32
    %2 = arith.cmpi ne, %1, %c0_i32_0 : i32
    scf.if %2 {
      %c0_79 = arith.constant 0 : index
      %c0_80 = arith.constant 0 : index
      %c0_81 = arith.constant 0 : index
      %145 = vector.load %arg3[%c0_79, %c0_80, %c0_81] : memref<1x16x32xf32, #tpu.memory_space<vmem>>, vector<1x16x32xf32>
      %146 = vector.shape_cast %145 : vector<1x16x32xf32> to vector<16x32xf32>
      %147 = arith.truncf %146 : vector<16x32xf32> to vector<16x32xbf16>
      %c0_82 = arith.constant 0 : index
      %c0_83 = arith.constant 0 : index
      %148 = vector.load %arg6[%c0_82, %c0_83] : memref<32x32xbf16, #tpu.memory_space<vmem>>, vector<32x32xbf16>
      %cst_84 = arith.constant dense<0.000000e+00> : vector<16x32xf32>
      %149 = tpu.matmul %147, %148, %cst_84 {dimension_numbers = #tpu.dot_dimension_numbers<[1], [0], [0], [1], [0, 0, 1, 1], [], []>} : vector<16x32xbf16>, vector<32x32xbf16>, vector<16x32xf32> -> vector<16x32xf32>
      %c0_85 = arith.constant 0 : index
      %c0_86 = arith.constant 0 : index
      %150 = vector.load %arg7[%c0_85, %c0_86] : memref<1x32xf32, #tpu.memory_space<vmem>>, vector<1x32xf32>
      %151 = vector.broadcast %150 : vector<1x32xf32> to vector<16x32xf32>
      %152 = arith.addf %149, %151 : vector<16x32xf32>
      %153 = arith.truncf %152 : vector<16x32xf32> to vector<16x32xbf16>
      %c0_87 = arith.constant 0 : index
      %c0_88 = arith.constant 0 : index
      %154 = vector.load %arg20[%c0_87, %c0_88] : memref<16x32xbf16, #tpu.memory_space<vmem>>, vector<16x32xbf16>
      tpu.vector_store %arg20[%c0_87, %c0_88], %153 {strides = array<i32>} : memref<16x32xbf16, #tpu.memory_space<vmem>>, vector<16x32xbf16>,
      %cst_89 = arith.constant 0xFF800000 : f32
      %155 = vector.broadcast %cst_89 : f32 to vector<16x4xf32>
      %c0_90 = arith.constant 0 : index
      %c0_91 = arith.constant 0 : index
      %156 = vector.load %arg21[%c0_90, %c0_91] : memref<16x4xf32, #tpu.memory_space<vmem>>, vector<16x4xf32>
      tpu.vector_store %arg21[%c0_90, %c0_91], %155 {strides = array<i32>} : memref<16x4xf32, #tpu.memory_space<vmem>>, vector<16x4xf32>,
      %cst_92 = arith.constant 0.000000e+00 : f32
      %157 = vector.broadcast %cst_92 : f32 to vector<16x4xf32>
      %c0_93 = arith.constant 0 : index
      %c0_94 = arith.constant 0 : index
      %158 = vector.load %arg22[%c0_93, %c0_94] : memref<16x4xf32, #tpu.memory_space<vmem>>, vector<16x4xf32>
      tpu.vector_store %arg22[%c0_93, %c0_94], %157 {strides = array<i32>} : memref<16x4xf32, #tpu.memory_space<vmem>>, vector<16x4xf32>,
      %cst_95 = arith.constant 0.000000e+00 : f32
      %159 = vector.broadcast %cst_95 : f32 to vector<16x32xf32>
      %c0_96 = arith.constant 0 : index
      %c0_97 = arith.constant 0 : index
      %160 = vector.load %arg23[%c0_96, %c0_97] : memref<16x32xf32, #tpu.memory_space<vmem>>, vector<16x32xf32>
      tpu.vector_store %arg23[%c0_96, %c0_97], %159 {strides = array<i32>} : memref<16x32xf32, #tpu.memory_space<vmem>>, vector<16x32xf32>,
    } else {
    }
    %c0 = arith.constant 0 : index
    %c0_1 = arith.constant 0 : index
    %c0_2 = arith.constant 0 : index
    %3 = vector.load %arg4[%c0, %c0_1, %c0_2] : memref<1x16x32xf32, #tpu.memory_space<vmem>>, vector<1x16x32xf32>
    %4 = vector.shape_cast %3 : vector<1x16x32xf32> to vector<16x32xf32>
    %5 = arith.truncf %4 : vector<16x32xf32> to vector<16x32xbf16>
    %c0_3 = arith.constant 0 : index
    %c0_4 = arith.constant 0 : index
    %6 = vector.load %arg8[%c0_3, %c0_4] : memref<32x32xbf16, #tpu.memory_space<vmem>>, vector<32x32xbf16>
    %cst = arith.constant dense<0.000000e+00> : vector<16x32xf32>
    %7 = tpu.matmul %5, %6, %cst {dimension_numbers = #tpu.dot_dimension_numbers<[1], [0], [0], [1], [0, 0, 1, 1], [], []>} : vector<16x32xbf16>, vector<32x32xbf16>, vector<16x32xf32> -> vector<16x32xf32>
    %c0_5 = arith.constant 0 : index
    %c0_6 = arith.constant 0 : index
    %8 = vector.load %arg9[%c0_5, %c0_6] : memref<1x32xf32, #tpu.memory_space<vmem>>, vector<1x32xf32>
    %9 = vector.broadcast %8 : vector<1x32xf32> to vector<16x32xf32>
    %10 = arith.addf %7, %9 : vector<16x32xf32>
    %11 = arith.truncf %10 : vector<16x32xf32> to vector<16x32xbf16>
    %c0_7 = arith.constant 0 : index
    %c0_8 = arith.constant 0 : index
    %12 = vector.load %arg10[%c0_7, %c0_8] : memref<32x32xbf16, #tpu.memory_space<vmem>>, vector<32x32xbf16>
    %cst_9 = arith.constant dense<0.000000e+00> : vector<16x32xf32>
    %13 = tpu.matmul %5, %12, %cst_9 {dimension_numbers = #tpu.dot_dimension_numbers<[1], [0], [0], [1], [0, 0, 1, 1], [], []>} : vector<16x32xbf16>, vector<32x32xbf16>, vector<16x32xf32> -> vector<16x32xf32>
    %c0_10 = arith.constant 0 : index
    %c0_11 = arith.constant 0 : index
    %14 = vector.load %arg11[%c0_10, %c0_11] : memref<1x32xf32, #tpu.memory_space<vmem>>, vector<1x32xf32>
    %15 = vector.broadcast %14 : vector<1x32xf32> to vector<16x32xf32>
    %16 = arith.addf %13, %15 : vector<16x32xf32>
    %17 = arith.truncf %16 : vector<16x32xf32> to vector<16x32xbf16>
    %c0_12 = arith.constant 0 : index
    %c0_13 = arith.constant 0 : index
    %c0_14 = arith.constant 0 : index
    %18 = vector.load %arg5[%c0_12, %c0_13, %c0_14] : memref<1x16x16xi8, #tpu.memory_space<vmem>>, vector<1x16x16xi8>
    %19 = vector.shape_cast %18 : vector<1x16x16xi8> to vector<16x16xi8>
    %20 = arith.sitofp %19 : vector<16x16xi8> to vector<16x16xf32>
    %cst_15 = arith.constant 1.000000e+00 : f32
    %21 = vector.broadcast %cst_15 : f32 to vector<16x16xf32>
    %22 = arith.subf %20, %21 : vector<16x16xf32>
    %cst_16 = arith.constant 1.000000e+09 : f32
    %23 = vector.broadcast %cst_16 : f32 to vector<16x16xf32>
    %24 = arith.mulf %22, %23 : vector<16x16xf32>
    %c0_17 = arith.constant 0 : index
    %c0_18 = arith.constant 0 : index
    %25 = vector.load %arg20[%c0_17, %c0_18] : memref<16x32xbf16, #tpu.memory_space<vmem>>, vector<16x32xbf16>
    %26 = vector.extract_strided_slice %25 {offsets = [0, 0], sizes = [16, 8], strides = [1, 1]} : vector<16x32xbf16> to vector<16x8xbf16>
    %27 = vector.extract_strided_slice %11 {offsets = [0, 0], sizes = [16, 8], strides = [1, 1]} : vector<16x32xbf16> to vector<16x8xbf16>
    %cst_19 = arith.constant dense<0.000000e+00> : vector<16x16xf32>
    %28 = tpu.matmul %26, %27, %cst_19 {dimension_numbers = #tpu.dot_dimension_numbers<[1], [1], [0], [0], [0, 0, 1, 0], [], []>} : vector<16x8xbf16>, vector<16x8xbf16>, vector<16x16xf32> -> vector<16x16xf32>
    %29 = arith.addf %28, %24 : vector<16x16xf32>
    %c0_20 = arith.constant 0 : index
    %c0_21 = arith.constant 0 : index
    %30 = vector.load %arg21[%c0_20, %c0_21] : memref<16x4xf32, #tpu.memory_space<vmem>>, vector<16x1xf32>
    %cst_22 = arith.constant dense<0xFF800000> : vector<16xf32>
    %31 = vector.multi_reduction <maximumf>, %29, %cst_22 [1] : vector<16x16xf32> to vector<16xf32>
    %32 = vector.shape_cast %31 : vector<16xf32> to vector<16x1xf32>
    %33 = arith.maximumf %30, %32 : vector<16x1xf32>
    %34 = arith.subf %30, %33 : vector<16x1xf32>
    %35 = math.exp %34 : vector<16x1xf32>
    %36 = vector.broadcast %33 : vector<16x1xf32> to vector<16x16xf32>
    %37 = arith.subf %29, %36 : vector<16x16xf32>
    %38 = arith.truncf %37 : vector<16x16xf32> to vector<16x16xbf16>
    %39 = math.exp %38 : vector<16x16xbf16>
    %c0_23 = arith.constant 0 : index
    %c0_24 = arith.constant 0 : index
    %40 = vector.load %arg22[%c0_23, %c0_24] : memref<16x4xf32, #tpu.memory_space<vmem>>, vector<16x1xf32>
    %41 = arith.mulf %35, %40 : vector<16x1xf32>
    %42 = arith.extf %39 : vector<16x16xbf16> to vector<16x16xf32>
    %cst_25 = arith.constant dense<0.000000e+00> : vector<16xf32>
    %43 = vector.multi_reduction <add>, %42, %cst_25 [1] : vector<16x16xf32> to vector<16xf32>
    %44 = vector.shape_cast %43 : vector<16xf32> to vector<16x1xf32>
    %45 = arith.addf %41, %44 : vector<16x1xf32>
    %c0_26 = arith.constant 0 : index
    %c0_27 = arith.constant 0 : index
    %46 = vector.load %arg22[%c0_26, %c0_27] : memref<16x4xf32, #tpu.memory_space<vmem>>, vector<16x1xf32>
    tpu.vector_store %arg22[%c0_26, %c0_27], %45 {strides = array<i32>} : memref<16x4xf32, #tpu.memory_space<vmem>>, vector<16x1xf32>,
    %c0_28 = arith.constant 0 : index
    %c0_29 = arith.constant 0 : index
    %47 = vector.load %arg23[%c0_28, %c0_29] : memref<16x32xf32, #tpu.memory_space<vmem>>, vector<16x8xf32>
    %48 = vector.broadcast %35 : vector<16x1xf32> to vector<16x8xf32>
    %49 = arith.mulf %48, %47 : vector<16x8xf32>
    %50 = vector.extract_strided_slice %17 {offsets = [0, 0], sizes = [16, 8], strides = [1, 1]} : vector<16x32xbf16> to vector<16x8xbf16>
    %cst_30 = arith.constant dense<0.000000e+00> : vector<16x8xf32>
    %51 = tpu.matmul %39, %50, %cst_30 {dimension_numbers = #tpu.dot_dimension_numbers<[1], [0], [0], [1], [0, 0, 1, 1], [], []>} : vector<16x16xbf16>, vector<16x8xbf16>, vector<16x8xf32> -> vector<16x8xf32>
    %52 = arith.addf %49, %51 : vector<16x8xf32>
    %c0_31 = arith.constant 0 : index
    %c0_32 = arith.constant 0 : index
    %53 = vector.load %arg23[%c0_31, %c0_32] : memref<16x32xf32, #tpu.memory_space<vmem>>, vector<16x8xf32>
    tpu.vector_store %arg23[%c0_31, %c0_32], %52 {strides = array<i32>} : memref<16x32xf32, #tpu.memory_space<vmem>>, vector<16x8xf32>,
    %c0_33 = arith.constant 0 : index
    %c0_34 = arith.constant 0 : index
    %54 = vector.load %arg21[%c0_33, %c0_34] : memref<16x4xf32, #tpu.memory_space<vmem>>, vector<16x1xf32>
    tpu.vector_store %arg21[%c0_33, %c0_34], %33 {strides = array<i32>} : memref<16x4xf32, #tpu.memory_space<vmem>>, vector<16x1xf32>,
    %55 = vector.extract_strided_slice %25 {offsets = [0, 8], sizes = [16, 8], strides = [1, 1]} : vector<16x32xbf16> to vector<16x8xbf16>
    %56 = vector.extract_strided_slice %11 {offsets = [0, 8], sizes = [16, 8], strides = [1, 1]} : vector<16x32xbf16> to vector<16x8xbf16>
    %cst_35 = arith.constant dense<0.000000e+00> : vector<16x16xf32>
    %57 = tpu.matmul %55, %56, %cst_35 {dimension_numbers = #tpu.dot_dimension_numbers<[1], [1], [0], [0], [0, 0, 1, 0], [], []>} : vector<16x8xbf16>, vector<16x8xbf16>, vector<16x16xf32> -> vector<16x16xf32>
    %58 = arith.addf %57, %24 : vector<16x16xf32>
    %c0_36 = arith.constant 0 : index
    %c1 = arith.constant 1 : index
    %59 = vector.load %arg21[%c0_36, %c1] : memref<16x4xf32, #tpu.memory_space<vmem>>, vector<16x1xf32>
    %cst_37 = arith.constant dense<0xFF800000> : vector<16xf32>
    %60 = vector.multi_reduction <maximumf>, %58, %cst_37 [1] : vector<16x16xf32> to vector<16xf32>
    %61 = vector.shape_cast %60 : vector<16xf32> to vector<16x1xf32>
    %62 = arith.maximumf %59, %61 : vector<16x1xf32>
    %63 = arith.subf %59, %62 : vector<16x1xf32>
    %64 = math.exp %63 : vector<16x1xf32>
    %65 = vector.broadcast %62 : vector<16x1xf32> to vector<16x16xf32>
    %66 = arith.subf %58, %65 : vector<16x16xf32>
    %67 = arith.truncf %66 : vector<16x16xf32> to vector<16x16xbf16>
    %68 = math.exp %67 : vector<16x16xbf16>
    %c0_38 = arith.constant 0 : index
    %c1_39 = arith.constant 1 : index
    %69 = vector.load %arg22[%c0_38, %c1_39] : memref<16x4xf32, #tpu.memory_space<vmem>>, vector<16x1xf32>
    %70 = arith.mulf %64, %69 : vector<16x1xf32>
    %71 = arith.extf %68 : vector<16x16xbf16> to vector<16x16xf32>
    %cst_40 = arith.constant dense<0.000000e+00> : vector<16xf32>
    %72 = vector.multi_reduction <add>, %71, %cst_40 [1] : vector<16x16xf32> to vector<16xf32>
    %73 = vector.shape_cast %72 : vector<16xf32> to vector<16x1xf32>
    %74 = arith.addf %70, %73 : vector<16x1xf32>
    %c0_41 = arith.constant 0 : index
    %c1_42 = arith.constant 1 : index
    %75 = vector.load %arg22[%c0_41, %c1_42] : memref<16x4xf32, #tpu.memory_space<vmem>>, vector<16x1xf32>
    tpu.vector_store %arg22[%c0_41, %c1_42], %74 {strides = array<i32>} : memref<16x4xf32, #tpu.memory_space<vmem>>, vector<16x1xf32>,
    %c0_43 = arith.constant 0 : index
    %c8 = arith.constant 8 : index
    %76 = vector.load %arg23[%c0_43, %c8] : memref<16x32xf32, #tpu.memory_space<vmem>>, vector<16x8xf32>
    %77 = vector.broadcast %64 : vector<16x1xf32> to vector<16x8xf32>
    %78 = arith.mulf %77, %76 : vector<16x8xf32>
    %79 = vector.extract_strided_slice %17 {offsets = [0, 8], sizes = [16, 8], strides = [1, 1]} : vector<16x32xbf16> to vector<16x8xbf16>
    %cst_44 = arith.constant dense<0.000000e+00> : vector<16x8xf32>
    %80 = tpu.matmul %68, %79, %cst_44 {dimension_numbers = #tpu.dot_dimension_numbers<[1], [0], [0], [1], [0, 0, 1, 1], [], []>} : vector<16x16xbf16>, vector<16x8xbf16>, vector<16x8xf32> -> vector<16x8xf32>
    %81 = arith.addf %78, %80 : vector<16x8xf32>
    %c0_45 = arith.constant 0 : index
    %c8_46 = arith.constant 8 : index
    %82 = vector.load %arg23[%c0_45, %c8_46] : memref<16x32xf32, #tpu.memory_space<vmem>>, vector<16x8xf32>
    tpu.vector_store %arg23[%c0_45, %c8_46], %81 {strides = array<i32>} : memref<16x32xf32, #tpu.memory_space<vmem>>, vector<16x8xf32>,
    %c0_47 = arith.constant 0 : index
    %c1_48 = arith.constant 1 : index
    %83 = vector.load %arg21[%c0_47, %c1_48] : memref<16x4xf32, #tpu.memory_space<vmem>>, vector<16x1xf32>
    tpu.vector_store %arg21[%c0_47, %c1_48], %62 {strides = array<i32>} : memref<16x4xf32, #tpu.memory_space<vmem>>, vector<16x1xf32>,
    %84 = vector.extract_strided_slice %25 {offsets = [0, 16], sizes = [16, 8], strides = [1, 1]} : vector<16x32xbf16> to vector<16x8xbf16>
    %85 = vector.extract_strided_slice %11 {offsets = [0, 16], sizes = [16, 8], strides = [1, 1]} : vector<16x32xbf16> to vector<16x8xbf16>
    %cst_49 = arith.constant dense<0.000000e+00> : vector<16x16xf32>
    %86 = tpu.matmul %84, %85, %cst_49 {dimension_numbers = #tpu.dot_dimension_numbers<[1], [1], [0], [0], [0, 0, 1, 0], [], []>} : vector<16x8xbf16>, vector<16x8xbf16>, vector<16x16xf32> -> vector<16x16xf32>
    %87 = arith.addf %86, %24 : vector<16x16xf32>
    %c0_50 = arith.constant 0 : index
    %c2 = arith.constant 2 : index
    %88 = vector.load %arg21[%c0_50, %c2] : memref<16x4xf32, #tpu.memory_space<vmem>>, vector<16x1xf32>
    %cst_51 = arith.constant dense<0xFF800000> : vector<16xf32>
    %89 = vector.multi_reduction <maximumf>, %87, %cst_51 [1] : vector<16x16xf32> to vector<16xf32>
    %90 = vector.shape_cast %89 : vector<16xf32> to vector<16x1xf32>
    %91 = arith.maximumf %88, %90 : vector<16x1xf32>
    %92 = arith.subf %88, %91 : vector<16x1xf32>
    %93 = math.exp %92 : vector<16x1xf32>
    %94 = vector.broadcast %91 : vector<16x1xf32> to vector<16x16xf32>
    %95 = arith.subf %87, %94 : vector<16x16xf32>
    %96 = arith.truncf %95 : vector<16x16xf32> to vector<16x16xbf16>
    %97 = math.exp %96 : vector<16x16xbf16>
    %c0_52 = arith.constant 0 : index
    %c2_53 = arith.constant 2 : index
    %98 = vector.load %arg22[%c0_52, %c2_53] : memref<16x4xf32, #tpu.memory_space<vmem>>, vector<16x1xf32>
    %99 = arith.mulf %93, %98 : vector<16x1xf32>
    %100 = arith.extf %97 : vector<16x16xbf16> to vector<16x16xf32>
    %cst_54 = arith.constant dense<0.000000e+00> : vector<16xf32>
    %101 = vector.multi_reduction <add>, %100, %cst_54 [1] : vector<16x16xf32> to vector<16xf32>
    %102 = vector.shape_cast %101 : vector<16xf32> to vector<16x1xf32>
    %103 = arith.addf %99, %102 : vector<16x1xf32>
    %c0_55 = arith.constant 0 : index
    %c2_56 = arith.constant 2 : index
    %104 = vector.load %arg22[%c0_55, %c2_56] : memref<16x4xf32, #tpu.memory_space<vmem>>, vector<16x1xf32>
    tpu.vector_store %arg22[%c0_55, %c2_56], %103 {strides = array<i32>} : memref<16x4xf32, #tpu.memory_space<vmem>>, vector<16x1xf32>,
    %c0_57 = arith.constant 0 : index
    %c16 = arith.constant 16 : index
    %105 = vector.load %arg23[%c0_57, %c16] : memref<16x32xf32, #tpu.memory_space<vmem>>, vector<16x8xf32>
    %106 = vector.broadcast %93 : vector<16x1xf32> to vector<16x8xf32>
    %107 = arith.mulf %106, %105 : vector<16x8xf32>
    %108 = vector.extract_strided_slice %17 {offsets = [0, 16], sizes = [16, 8], strides = [1, 1]} : vector<16x32xbf16> to vector<16x8xbf16>
    %cst_58 = arith.constant dense<0.000000e+00> : vector<16x8xf32>
    %109 = tpu.matmul %97, %108, %cst_58 {dimension_numbers = #tpu.dot_dimension_numbers<[1], [0], [0], [1], [0, 0, 1, 1], [], []>} : vector<16x16xbf16>, vector<16x8xbf16>, vector<16x8xf32> -> vector<16x8xf32>
    %110 = arith.addf %107, %109 : vector<16x8xf32>
    %c0_59 = arith.constant 0 : index
    %c16_60 = arith.constant 16 : index
    %111 = vector.load %arg23[%c0_59, %c16_60] : memref<16x32xf32, #tpu.memory_space<vmem>>, vector<16x8xf32>
    tpu.vector_store %arg23[%c0_59, %c16_60], %110 {strides = array<i32>} : memref<16x32xf32, #tpu.memory_space<vmem>>, vector<16x8xf32>,
    %c0_61 = arith.constant 0 : index
    %c2_62 = arith.constant 2 : index
    %112 = vector.load %arg21[%c0_61, %c2_62] : memref<16x4xf32, #tpu.memory_space<vmem>>, vector<16x1xf32>
    tpu.vector_store %arg21[%c0_61, %c2_62], %91 {strides = array<i32>} : memref<16x4xf32, #tpu.memory_space<vmem>>, vector<16x1xf32>,
    %113 = vector.extract_strided_slice %25 {offsets = [0, 24], sizes = [16, 8], strides = [1, 1]} : vector<16x32xbf16> to vector<16x8xbf16>
    %114 = vector.extract_strided_slice %11 {offsets = [0, 24], sizes = [16, 8], strides = [1, 1]} : vector<16x32xbf16> to vector<16x8xbf16>
    %cst_63 = arith.constant dense<0.000000e+00> : vector<16x16xf32>
    %115 = tpu.matmul %113, %114, %cst_63 {dimension_numbers = #tpu.dot_dimension_numbers<[1], [1], [0], [0], [0, 0, 1, 0], [], []>} : vector<16x8xbf16>, vector<16x8xbf16>, vector<16x16xf32> -> vector<16x16xf32>
    %116 = arith.addf %115, %24 : vector<16x16xf32>
    %c0_64 = arith.constant 0 : index
    %c3 = arith.constant 3 : index
    %117 = vector.load %arg21[%c0_64, %c3] : memref<16x4xf32, #tpu.memory_space<vmem>>, vector<16x1xf32>
    %cst_65 = arith.constant dense<0xFF800000> : vector<16xf32>
    %118 = vector.multi_reduction <maximumf>, %116, %cst_65 [1] : vector<16x16xf32> to vector<16xf32>
    %119 = vector.shape_cast %118 : vector<16xf32> to vector<16x1xf32>
    %120 = arith.maximumf %117, %119 : vector<16x1xf32>
    %121 = arith.subf %117, %120 : vector<16x1xf32>
    %122 = math.exp %121 : vector<16x1xf32>
    %123 = vector.broadcast %120 : vector<16x1xf32> to vector<16x16xf32>
    %124 = arith.subf %116, %123 : vector<16x16xf32>
    %125 = arith.truncf %124 : vector<16x16xf32> to vector<16x16xbf16>
    %126 = math.exp %125 : vector<16x16xbf16>
    %c0_66 = arith.constant 0 : index
    %c3_67 = arith.constant 3 : index
    %127 = vector.load %arg22[%c0_66, %c3_67] : memref<16x4xf32, #tpu.memory_space<vmem>>, vector<16x1xf32>
    %128 = arith.mulf %122, %127 : vector<16x1xf32>
    %129 = arith.extf %126 : vector<16x16xbf16> to vector<16x16xf32>
    %cst_68 = arith.constant dense<0.000000e+00> : vector<16xf32>
    %130 = vector.multi_reduction <add>, %129, %cst_68 [1] : vector<16x16xf32> to vector<16xf32>
    %131 = vector.shape_cast %130 : vector<16xf32> to vector<16x1xf32>
    %132 = arith.addf %128, %131 : vector<16x1xf32>
    %c0_69 = arith.constant 0 : index
    %c3_70 = arith.constant 3 : index
    %133 = vector.load %arg22[%c0_69, %c3_70] : memref<16x4xf32, #tpu.memory_space<vmem>>, vector<16x1xf32>
    tpu.vector_store %arg22[%c0_69, %c3_70], %132 {strides = array<i32>} : memref<16x4xf32, #tpu.memory_space<vmem>>, vector<16x1xf32>,
    %c0_71 = arith.constant 0 : index
    %c24 = arith.constant 24 : index
    %134 = vector.load %arg23[%c0_71, %c24] : memref<16x32xf32, #tpu.memory_space<vmem>>, vector<16x8xf32>
    %135 = vector.broadcast %122 : vector<16x1xf32> to vector<16x8xf32>
    %136 = arith.mulf %135, %134 : vector<16x8xf32>
    %137 = vector.extract_strided_slice %17 {offsets = [0, 24], sizes = [16, 8], strides = [1, 1]} : vector<16x32xbf16> to vector<16x8xbf16>
    %cst_72 = arith.constant dense<0.000000e+00> : vector<16x8xf32>
    %138 = tpu.matmul %126, %137, %cst_72 {dimension_numbers = #tpu.dot_dimension_numbers<[1], [0], [0], [1], [0, 0, 1, 1], [], []>} : vector<16x16xbf16>, vector<16x8xbf16>, vector<16x8xf32> -> vector<16x8xf32>
    %139 = arith.addf %136, %138 : vector<16x8xf32>
    %c0_73 = arith.constant 0 : index
    %c24_74 = arith.constant 24 : index
    %140 = vector.load %arg23[%c0_73, %c24_74] : memref<16x32xf32, #tpu.memory_space<vmem>>, vector<16x8xf32>
    tpu.vector_store %arg23[%c0_73, %c24_74], %139 {strides = array<i32>} : memref<16x32xf32, #tpu.memory_space<vmem>>, vector<16x8xf32>,
    %c0_75 = arith.constant 0 : index
    %c3_76 = arith.constant 3 : index
    %141 = vector.load %arg21[%c0_75, %c3_76] : memref<16x4xf32, #tpu.memory_space<vmem>>, vector<16x1xf32>
    tpu.vector_store %arg21[%c0_75, %c3_76], %120 {strides = array<i32>} : memref<16x4xf32, #tpu.memory_space<vmem>>, vector<16x1xf32>,
    %c0_i32_77 = arith.constant 0 : i32
    %142 = arith.cmpi eq, %arg1, %c0_i32_77 : i32
    %143 = arith.extui %142 : i1 to i32
    %c0_i32_78 = arith.constant 0 : i32
    %144 = arith.cmpi ne, %143, %c0_i32_78 : i32
    scf.if %144 {
      %c0_79 = arith.constant 0 : index
      %c0_80 = arith.constant 0 : index
      %c0_81 = arith.constant 0 : index
      %145 = vector.load %arg3[%c0_79, %c0_80, %c0_81] : memref<1x16x32xf32, #tpu.memory_space<vmem>>, vector<1x16x32xf32>
      %146 = vector.shape_cast %145 : vector<1x16x32xf32> to vector<16x32xf32>
      %c0_82 = arith.constant 0 : index
      %c0_83 = arith.constant 0 : index
      %147 = vector.load %arg22[%c0_82, %c0_83] : memref<16x4xf32, #tpu.memory_space<vmem>>, vector<16x1xf32>
      %148 = tpu.reciprocal %147 {approx = true} : vector<16x1xf32> -> vector<16x1xf32>
      %c0_84 = arith.constant 0 : index
      %c0_85 = arith.constant 0 : index
      %149 = vector.load %arg23[%c0_84, %c0_85] : memref<16x32xf32, #tpu.memory_space<vmem>>, vector<16x8xf32>
      %150 = vector.broadcast %148 : vector<16x1xf32> to vector<16x8xf32>
      %151 = arith.mulf %149, %150 : vector<16x8xf32>
      %152 = arith.truncf %151 : vector<16x8xf32> to vector<16x8xbf16>
      %c0_86 = arith.constant 0 : index
      %c0_87 = arith.constant 0 : index
      %153 = vector.load %arg12[%c0_86, %c0_87] : memref<32x32xbf16, #tpu.memory_space<vmem>>, vector<8x32xbf16>
      %cst_88 = arith.constant dense<0.000000e+00> : vector<16x32xf32>
      %154 = tpu.matmul %152, %153, %cst_88 {dimension_numbers = #tpu.dot_dimension_numbers<[1], [0], [0], [1], [0, 0, 1, 1], [], []>} : vector<16x8xbf16>, vector<8x32xbf16>, vector<16x32xf32> -> vector<16x32xf32>
      %c0_89 = arith.constant 0 : index
      %c1_90 = arith.constant 1 : index
      %155 = vector.load %arg22[%c0_89, %c1_90] : memref<16x4xf32, #tpu.memory_space<vmem>>, vector<16x1xf32>
      %156 = tpu.reciprocal %155 {approx = true} : vector<16x1xf32> -> vector<16x1xf32>
      %c0_91 = arith.constant 0 : index
      %c8_92 = arith.constant 8 : index
      %157 = vector.load %arg23[%c0_91, %c8_92] : memref<16x32xf32, #tpu.memory_space<vmem>>, vector<16x8xf32>
      %158 = vector.broadcast %156 : vector<16x1xf32> to vector<16x8xf32>
      %159 = arith.mulf %157, %158 : vector<16x8xf32>
      %160 = arith.truncf %159 : vector<16x8xf32> to vector<16x8xbf16>
      %c8_93 = arith.constant 8 : index
      %c0_94 = arith.constant 0 : index
      %161 = vector.load %arg12[%c8_93, %c0_94] : memref<32x32xbf16, #tpu.memory_space<vmem>>, vector<8x32xbf16>
      %cst_95 = arith.constant dense<0.000000e+00> : vector<16x32xf32>
      %162 = tpu.matmul %160, %161, %cst_95 {dimension_numbers = #tpu.dot_dimension_numbers<[1], [0], [0], [1], [0, 0, 1, 1], [], []>} : vector<16x8xbf16>, vector<8x32xbf16>, vector<16x32xf32> -> vector<16x32xf32>
      %163 = arith.addf %154, %162 : vector<16x32xf32>
      %c0_96 = arith.constant 0 : index
      %c2_97 = arith.constant 2 : index
      %164 = vector.load %arg22[%c0_96, %c2_97] : memref<16x4xf32, #tpu.memory_space<vmem>>, vector<16x1xf32>
      %165 = tpu.reciprocal %164 {approx = true} : vector<16x1xf32> -> vector<16x1xf32>
      %c0_98 = arith.constant 0 : index
      %c16_99 = arith.constant 16 : index
      %166 = vector.load %arg23[%c0_98, %c16_99] : memref<16x32xf32, #tpu.memory_space<vmem>>, vector<16x8xf32>
      %167 = vector.broadcast %165 : vector<16x1xf32> to vector<16x8xf32>
      %168 = arith.mulf %166, %167 : vector<16x8xf32>
      %169 = arith.truncf %168 : vector<16x8xf32> to vector<16x8xbf16>
      %c16_100 = arith.constant 16 : index
      %c0_101 = arith.constant 0 : index
      %170 = vector.load %arg12[%c16_100, %c0_101] : memref<32x32xbf16, #tpu.memory_space<vmem>>, vector<8x32xbf16>
      %cst_102 = arith.constant dense<0.000000e+00> : vector<16x32xf32>
      %171 = tpu.matmul %169, %170, %cst_102 {dimension_numbers = #tpu.dot_dimension_numbers<[1], [0], [0], [1], [0, 0, 1, 1], [], []>} : vector<16x8xbf16>, vector<8x32xbf16>, vector<16x32xf32> -> vector<16x32xf32>
      %172 = arith.addf %163, %171 : vector<16x32xf32>
      %c0_103 = arith.constant 0 : index
      %c3_104 = arith.constant 3 : index
      %173 = vector.load %arg22[%c0_103, %c3_104] : memref<16x4xf32, #tpu.memory_space<vmem>>, vector<16x1xf32>
      %174 = tpu.reciprocal %173 {approx = true} : vector<16x1xf32> -> vector<16x1xf32>
      %c0_105 = arith.constant 0 : index
      %c24_106 = arith.constant 24 : index
      %175 = vector.load %arg23[%c0_105, %c24_106] : memref<16x32xf32, #tpu.memory_space<vmem>>, vector<16x8xf32>
      %176 = vector.broadcast %174 : vector<16x1xf32> to vector<16x8xf32>
      %177 = arith.mulf %175, %176 : vector<16x8xf32>
      %178 = arith.truncf %177 : vector<16x8xf32> to vector<16x8xbf16>
      %c24_107 = arith.constant 24 : index
      %c0_108 = arith.constant 0 : index
      %179 = vector.load %arg12[%c24_107, %c0_108] : memref<32x32xbf16, #tpu.memory_space<vmem>>, vector<8x32xbf16>
      %cst_109 = arith.constant dense<0.000000e+00> : vector<16x32xf32>
      %180 = tpu.matmul %178, %179, %cst_109 {dimension_numbers = #tpu.dot_dimension_numbers<[1], [0], [0], [1], [0, 0, 1, 1], [], []>} : vector<16x8xbf16>, vector<8x32xbf16>, vector<16x32xf32> -> vector<16x32xf32>
      %181 = arith.addf %172, %180 : vector<16x32xf32>
      %c0_110 = arith.constant 0 : index
      %c0_111 = arith.constant 0 : index
      %182 = vector.load %arg13[%c0_110, %c0_111] : memref<1x32xf32, #tpu.memory_space<vmem>>, vector<1x32xf32>
      %183 = vector.broadcast %182 : vector<1x32xf32> to vector<16x32xf32>
      %184 = arith.addf %181, %183 : vector<16x32xf32>
      %185 = arith.truncf %146 : vector<16x32xf32> to vector<16x32xbf16>
      %c0_112 = arith.constant 0 : index
      %c0_113 = arith.constant 0 : index
      %186 = vector.load %arg14[%c0_112, %c0_113] : memref<32x64xbf16, #tpu.memory_space<vmem>>, vector<32x64xbf16>
      %cst_114 = arith.constant dense<0.000000e+00> : vector<16x64xf32>
      %187 = tpu.matmul %185, %186, %cst_114 {dimension_numbers = #tpu.dot_dimension_numbers<[1], [0], [0], [1], [0, 0, 1, 1], [], []>} : vector<16x32xbf16>, vector<32x64xbf16>, vector<16x64xf32> -> vector<16x64xf32>
      %188 = arith.truncf %184 : vector<16x32xf32> to vector<16x32xbf16>
      %c0_115 = arith.constant 0 : index
      %c0_116 = arith.constant 0 : index
      %189 = vector.load %arg15[%c0_115, %c0_116] : memref<32x64xbf16, #tpu.memory_space<vmem>>, vector<32x64xbf16>
      %cst_117 = arith.constant dense<0.000000e+00> : vector<16x64xf32>
      %190 = tpu.matmul %188, %189, %cst_117 {dimension_numbers = #tpu.dot_dimension_numbers<[1], [0], [0], [1], [0, 0, 1, 1], [], []>} : vector<16x32xbf16>, vector<32x64xbf16>, vector<16x64xf32> -> vector<16x64xf32>
      %191 = arith.addf %187, %190 : vector<16x64xf32>
      %c0_118 = arith.constant 0 : index
      %c0_119 = arith.constant 0 : index
      %192 = vector.load %arg16[%c0_118, %c0_119] : memref<1x64xf32, #tpu.memory_space<vmem>>, vector<1x64xf32>
      %193 = vector.broadcast %192 : vector<1x64xf32> to vector<16x64xf32>
      %194 = arith.addf %191, %193 : vector<16x64xf32>
      %cst_120 = arith.constant dense<0.000000e+00> : vector<64xf32>
      %195 = vector.multi_reduction <add>, %194, %cst_120 [0] : vector<16x64xf32> to vector<64xf32>
      %196 = vector.shape_cast %195 : vector<64xf32> to vector<1x64xf32>
      %cst_121 = arith.constant 1.600000e+01 : f32
      %197 = vector.broadcast %cst_121 : f32 to vector<1x64xf32>
      %198 = arith.divf %196, %197 : vector<1x64xf32>
      %199 = vector.broadcast %198 : vector<1x64xf32> to vector<16x64xf32>
      %200 = arith.subf %194, %199 : vector<16x64xf32>
      %201 = arith.mulf %200, %200 : vector<16x64xf32>
      %cst_122 = arith.constant dense<0.000000e+00> : vector<64xf32>
      %202 = vector.multi_reduction <add>, %201, %cst_122 [0] : vector<16x64xf32> to vector<64xf32>
      %203 = vector.shape_cast %202 : vector<64xf32> to vector<1x64xf32>
      %cst_123 = arith.constant 1.600000e+01 : f32
      %204 = vector.broadcast %cst_123 : f32 to vector<1x64xf32>
      %205 = arith.divf %203, %204 : vector<1x64xf32>
      %206 = vector.broadcast %198 : vector<1x64xf32> to vector<16x64xf32>
      %207 = arith.subf %194, %206 : vector<16x64xf32>
      %cst_124 = arith.constant 9.99999974E-6 : f32
      %208 = vector.broadcast %cst_124 : f32 to vector<1x64xf32>
      %209 = arith.addf %205, %208 : vector<1x64xf32>
      %210 = math.rsqrt %209 : vector<1x64xf32>
      %211 = vector.broadcast %210 : vector<1x64xf32> to vector<16x64xf32>
      %212 = arith.mulf %207, %211 : vector<16x64xf32>
      %cst_125 = arith.constant 0.000000e+00 : f32
      %213 = vector.broadcast %cst_125 : f32 to vector<16x64xf32>
      %214 = arith.maximumf %212, %213 : vector<16x64xf32>
      %215 = arith.truncf %214 : vector<16x64xf32> to vector<16x64xbf16>
      %c0_126 = arith.constant 0 : index
      %c0_127 = arith.constant 0 : index
      %216 = vector.load %arg17[%c0_126, %c0_127] : memref<64x32xbf16, #tpu.memory_space<vmem>>, vector<64x32xbf16>
      %cst_128 = arith.constant dense<0.000000e+00> : vector<16x32xf32>
      %217 = tpu.matmul %215, %216, %cst_128 {dimension_numbers = #tpu.dot_dimension_numbers<[1], [0], [0], [1], [0, 0, 1, 1], [], []>} : vector<16x64xbf16>, vector<64x32xbf16>, vector<16x32xf32> -> vector<16x32xf32>
      %c0_129 = arith.constant 0 : index
      %c0_130 = arith.constant 0 : index
      %218 = vector.load %arg18[%c0_129, %c0_130] : memref<1x32xf32, #tpu.memory_space<vmem>>, vector<1x32xf32>
      %219 = vector.broadcast %218 : vector<1x32xf32> to vector<16x32xf32>
      %220 = arith.addf %217, %219 : vector<16x32xf32>
      %221 = arith.addf %146, %220 : vector<16x32xf32>
      %c0_131 = arith.constant 0 : index
      %c0_132 = arith.constant 0 : index
      %c0_133 = arith.constant 0 : index
      %222 = vector.load %arg19[%c0_131, %c0_132, %c0_133] : memref<1x16x32xf32, #tpu.memory_space<vmem>>, vector<1x16x32xf32>
      %223 = vector.shape_cast %222 : vector<1x16x32xf32> to vector<16x32xf32>
      %224 = vector.shape_cast %221 : vector<16x32xf32> to vector<1x16x32xf32>
      tpu.vector_store %arg19[%c0_131, %c0_132, %c0_133], %224 {strides = array<i32>} : memref<1x16x32xf32, #tpu.memory_space<vmem>>, vector<1x16x32xf32>,
    } else {
    }
    return
  }
  func.func @transform_0(%arg0: i32, %arg1: i32, %arg2: memref<4xi32, #tpu.memory_space<smem>>) -> (i32, i32, i32) {
    %c0_i32 = arith.constant 0 : i32
    %c0_i32_0 = arith.constant 0 : i32
    %c0_i32_1 = arith.constant 0 : i32
    return %arg0, %c0_i32, %c0_i32_0 : i32, i32, i32
  }
  func.func @transform_1(%arg0: i32, %arg1: i32, %arg2: memref<4xi32, #tpu.memory_space<smem>>) -> (i32, i32, i32) {
    %0 = arith.index_cast %arg0 : i32 to index
    %1 = memref.load %arg2[%0] : memref<4xi32, #tpu.memory_space<smem>>
    %c0_i32 = arith.constant 0 : i32
    %c0_i32_0 = arith.constant 0 : i32
    return %1, %arg1, %c0_i32 : i32, i32, i32
  }
  func.func @transform_2(%arg0: i32, %arg1: i32, %arg2: memref<4xi32, #tpu.memory_space<smem>>) -> (i32, i32, i32) {
    %c0_i32 = arith.constant 0 : i32
    %c0_i32_0 = arith.constant 0 : i32
    return %arg0, %c0_i32, %arg1 : i32, i32, i32
  }
  func.func @transform_3(%arg0: i32, %arg1: i32, %arg2: memref<4xi32, #tpu.memory_space<smem>>) -> (i32, i32) {
    %c0_i32 = arith.constant 0 : i32
    %c0_i32_0 = arith.constant 0 : i32
    %c0_i32_1 = arith.constant 0 : i32
    return %c0_i32, %c0_i32_0 : i32, i32
  }
  func.func @transform_4(%arg0: i32, %arg1: i32, %arg2: memref<4xi32, #tpu.memory_space<smem>>) -> (i32, i32) {
    %c0_i32 = arith.constant 0 : i32
    %c0_i32_0 = arith.constant 0 : i32
    %c0_i32_1 = arith.constant 0 : i32
    return %c0_i32, %c0_i32_0 : i32, i32
  }
  func.func @transform_5(%arg0: i32, %arg1: i32, %arg2: memref<4xi32, #tpu.memory_space<smem>>) -> (i32, i32) {
    %c0_i32 = arith.constant 0 : i32
    %c0_i32_0 = arith.constant 0 : i32
    %c0_i32_1 = arith.constant 0 : i32
    return %c0_i32, %c0_i32_0 : i32, i32
  }
  func.func @transform_6(%arg0: i32, %arg1: i32, %arg2: memref<4xi32, #tpu.memory_space<smem>>) -> (i32, i32) {
    %c0_i32 = arith.constant 0 : i32
    %c0_i32_0 = arith.constant 0 : i32
    %c0_i32_1 = arith.constant 0 : i32
    return %c0_i32, %c0_i32_0 : i32, i32
  }
  func.func @transform_7(%arg0: i32, %arg1: i32, %arg2: memref<4xi32, #tpu.memory_space<smem>>) -> (i32, i32) {
    %c0_i32 = arith.constant 0 : i32
    %c0_i32_0 = arith.constant 0 : i32
    %c0_i32_1 = arith.constant 0 : i32
    return %c0_i32, %c0_i32_0 : i32, i32
  }
  func.func @transform_8(%arg0: i32, %arg1: i32, %arg2: memref<4xi32, #tpu.memory_space<smem>>) -> (i32, i32) {
    %c0_i32 = arith.constant 0 : i32
    %c0_i32_0 = arith.constant 0 : i32
    %c0_i32_1 = arith.constant 0 : i32
    return %c0_i32, %c0_i32_0 : i32, i32
  }
  func.func @transform_9(%arg0: i32, %arg1: i32, %arg2: memref<4xi32, #tpu.memory_space<smem>>) -> (i32, i32) {
    %c0_i32 = arith.constant 0 : i32
    %c0_i32_0 = arith.constant 0 : i32
    %c0_i32_1 = arith.constant 0 : i32
    return %c0_i32, %c0_i32_0 : i32, i32
  }
  func.func @transform_10(%arg0: i32, %arg1: i32, %arg2: memref<4xi32, #tpu.memory_space<smem>>) -> (i32, i32) {
    %c0_i32 = arith.constant 0 : i32
    %c0_i32_0 = arith.constant 0 : i32
    %c0_i32_1 = arith.constant 0 : i32
    return %c0_i32, %c0_i32_0 : i32, i32
  }
  func.func @transform_11(%arg0: i32, %arg1: i32, %arg2: memref<4xi32, #tpu.memory_space<smem>>) -> (i32, i32) {
    %c0_i32 = arith.constant 0 : i32
    %c0_i32_0 = arith.constant 0 : i32
    %c0_i32_1 = arith.constant 0 : i32
    return %c0_i32, %c0_i32_0 : i32, i32
  }
  func.func @transform_12(%arg0: i32, %arg1: i32, %arg2: memref<4xi32, #tpu.memory_space<smem>>) -> (i32, i32) {
    %c0_i32 = arith.constant 0 : i32
    %c0_i32_0 = arith.constant 0 : i32
    %c0_i32_1 = arith.constant 0 : i32
    return %c0_i32, %c0_i32_0 : i32, i32
  }
  func.func @transform_13(%arg0: i32, %arg1: i32, %arg2: memref<4xi32, #tpu.memory_space<smem>>) -> (i32, i32) {
    %c0_i32 = arith.constant 0 : i32
    %c0_i32_0 = arith.constant 0 : i32
    %c0_i32_1 = arith.constant 0 : i32
    return %c0_i32, %c0_i32_0 : i32, i32
  }
  func.func @transform_14(%arg0: i32, %arg1: i32, %arg2: memref<4xi32, #tpu.memory_space<smem>>) -> (i32, i32) {
    %c0_i32 = arith.constant 0 : i32
    %c0_i32_0 = arith.constant 0 : i32
    %c0_i32_1 = arith.constant 0 : i32
    return %c0_i32, %c0_i32_0 : i32, i32
  }
  func.func @transform_15(%arg0: i32, %arg1: i32, %arg2: memref<4xi32, #tpu.memory_space<smem>>) -> (i32, i32) {
    %c0_i32 = arith.constant 0 : i32
    %c0_i32_0 = arith.constant 0 : i32
    %c0_i32_1 = arith.constant 0 : i32
    return %c0_i32, %c0_i32_0 : i32, i32
  }
  func.func @transform_16(%arg0: i32, %arg1: i32, %arg2: memref<4xi32, #tpu.memory_space<smem>>) -> (i32, i32, i32) {
    %c0_i32 = arith.constant 0 : i32
    %c0_i32_0 = arith.constant 0 : i32
    %c0_i32_1 = arith.constant 0 : i32
    return %arg0, %c0_i32, %c0_i32_0 : i32, i32, i32
  }
}

</mosaic_0001>

<bundles_post_ra>
// kernel: tpu_custom_call.1
= control target key start
LH: loop header
LB: loop body
LE: loop exit
PB: predicated region body
PF: predicated region fallthrough
CT: control target
= control target key end

     0   :  { %s4868_s0 = inlined_call_operand.hbm [shape: s32[4], index: 0, kind: input, shape index: {}]   ;;  %s4869_s1 = inlined_call_operand.hbm [shape: f32[4,16,32], index: 1, kind: input, shape index: {}]   ;;  %s4870_s2 = inlined_call_operand.hbm [shape: f32[4,16,32], index: 2, kind: input, shape index: {}]   ;;  %s4871_s3 = inlined_call_operand.hbm [shape: s8[4,16,16], index: 3, kind: input, shape index: {}]   ;;  %s4872_s4 = inlined_call_operand.hbm [shape: bf16[32,32], index: 4, kind: input, shape index: {}]   ;;  %s4873_s5 = inlined_call_operand.hbm [shape: f32[1,32], index: 5, kind: input, shape index: {}]   ;;  %s4874_s6 = inlined_call_operand.hbm [shape: bf16[32,32], index: 6, kind: input, shape index: {}]   ;;  %s4875_s7 = inlined_call_operand.hbm [shape: f32[1,32], index: 7, kind: input, shape index: {}]   ;;  %s4876_s8 = inlined_call_operand.hbm [shape: bf16[32,32], index: 8, kind: input, shape index: {}]   ;;  %s4877_s9 = inlined_call_operand.hbm [shape: f32[1,32], index: 9, kind: input, shape index: {}]   ;;  %s4878_s10 = inlined_call_operand.hbm [shape: bf16[32,32], index: 10, kind: input, shape index: {}]   ;;  %s4879_s11 = inlined_call_operand.hbm [shape: f32[1,32], index: 11, kind: input, shape index: {}]   ;;  %s4880_s12 = inlined_call_operand.hbm [shape: bf16[32,64], index: 12, kind: input, shape index: {}]   ;;  %s4881_s13 = inlined_call_operand.hbm [shape: bf16[32,64], index: 13, kind: input, shape index: {}]   ;;  %s4882_s14 = inlined_call_operand.hbm [shape: f32[1,64], index: 14, kind: input, shape index: {}]   ;;  %s4883_s15 = inlined_call_operand.hbm [shape: bf16[64,32], index: 15, kind: input, shape index: {}]   ;;  %s4884_s16 = inlined_call_operand.hbm [shape: f32[1,32], index: 16, kind: input, shape index: {}]   ;;  %s4885_s17 = inlined_call_operand.hbm [shape: f32[4,16,32], index: 17, kind: output, shape index: {}]  }
   0x1   :  { %4917 = sst [smem:[#allocation54_spill]] %s4868_s0 }
   0x2   :  { %4918 = sst [smem:[#allocation55_spill]] %s4869_s1  ;;  %s4935_s26 = sld [smem:[#allocation54_spill]] }
   0x3   :  { %4919 = sst [smem:[#allocation56_spill]] %s4870_s2 }
   0x4   :  { %4920 = sst [smem:[#allocation57_spill]] %s4871_s3 }
   0x5   :  { %4921 = sst [smem:[#allocation58_spill]] %s4872_s4 }
   0x6   :  { %4922 = sst [smem:[#allocation59_spill]] %s4873_s5 }
   0x7   :  { %4923 = sst [smem:[#allocation60_spill]] %s4874_s6 }
   0x8   :  { %4924 = sst [smem:[#allocation61_spill]] %s4875_s7  ;;  %s3120_s3 = scalar_lea.hbm %s4935_s26, 16 }
   0x9   :  { %4925 = sst [smem:[#allocation62_spill]] %s4876_s8  ;;  %p3121_p0 = scmp.ne.s32.totalorder %s4935_s26, %s3120_s3 }
   0xa   :  { %4926 = sst [smem:[#allocation63_spill]] %s4877_s9  ;;  %p3124_p1 = scmp.lt.u32.totalorder %s3120_s3, %s4935_s26 }
   0xb   :  { %4927 = sst [smem:[#allocation64_spill]] %s4878_s10 }
   0xc   :  { %4928 = sst [smem:[#allocation65_spill]] %s4879_s11  ;;  %p3126_p2 = pnand %p3124_p1, %p3121_p0 }
   0xd   :  { %4929 = sst [smem:[#allocation66_spill]] %s4880_s12 }
   0xe   :  { %4930 = sst [smem:[#allocation67_spill]] %s4881_s13 }
   0xf   :  { %4931 = sst [smem:[#allocation68_spill]] %s4882_s14 }
  0x10   :  { %4932 = sst [smem:[#allocation69_spill]] %s4883_s15 }
  0x11   :  { %4933 = sst [smem:[#allocation70_spill]] %s4884_s16 }
  0x12   :  { %4934 = sst [smem:[#allocation71_spill]] %s4885_s17 }
  0x13   :  { %3129 = shalt.err (!%p3126_p2)  }
  0x14   :  { %s3730_s30 = smov [#allocation7]  }
  0x15   :  { %23 = dma.hbm_to_smem %s4935_s26, 16, %s3730_s30, [#allocation6] }
  0x16   :  { %3648 = dma.done.wait [#allocation6], 16 }
  0x17   :  { %3649 = vsyncadd [#allocation6], 4294967280 }
  0x18   :  { %25 = sfence }
  0x19   :  { %26 = vsyncpa [#allocation9], 0 }
  0x1a   :  { %28 = vsyncpa [#allocation9 + $0x1], 0 }
  0x1b   :  { %29 = vsyncpa [#allocation12], 0 }
  0x1c   :  { %31 = vsyncpa [#allocation12 + $0x1], 0 }
  0x1d   :  { %32 = vsyncpa [#allocation15], 0 }
  0x1e   :  { %33 = vsyncpa [#allocation18], 0 }
  0x1f   :  { %34 = vsyncpa [#allocation21], 0 }
  0x20   :  { %35 = vsyncpa [#allocation24], 0 }
  0x21   :  { %36 = vsyncpa [#allocation27], 0 }
  0x22   :  { %37 = vsyncpa [#allocation30], 0 }
  0x23   :  { %38 = vsyncpa [#allocation33], 0 }
  0x24   :  { %39 = vsyncpa [#allocation10], 0 }
  0x25   :  { %41 = vsyncpa [#allocation10 + $0x1], 0  ;;  %s3870_s3 = smov 0   ;;  %s3872_s1 = smov 0  }
  0x26   :  { %s3874_s20 = smov 0   ;;  %s3876_s21 = smov 0  }
  0x27   :  { %s3878_s22 = smov 0   ;;  %s3880_s23 = smov 0  }
  0x28   :  { %s3882_s24 = smov 0   ;;  %s3884_s25 = smov 0  }
  0x29   :  { %s3886_s26 = smov 0  }
  0x2a LB: > { %4936 = sst [smem:[#allocation49_spill]] %s3708_s21  ;;  %s3916_s27 = sadd.s32 4294967295, %s3728_s26   ;;  %s3728_s26 = sphi %s3886_s26, %s47_s26   ;;  %s3724_s25 = sphi %s3884_s25, %s5015_s25   ;;  %s3720_s24 = sphi %s3882_s24, %s5014_s24   ;;  %s3716_s23 = sphi %s3880_s23, %s5013_s23   ;;  %s3712_s22 = sphi %s3878_s22, %s5012_s22   ;;  %s3708_s21 = sphi %s3876_s21, %s5007_s21   ;;  %s3704_s20 = sphi %s3874_s20, %s5011_s20   ;;  %s3700_s1 = sphi %s3872_s1, %s5010_s1   ;;  %s3696_s3 = sphi %s3870_s3, %s5009_s3  }
  0x2b   : > { %4937 = sst [smem:[#allocation50_spill]] %s3712_s22  ;;  %p2541_p3 = scmp.ge.s32.totalorder %s3728_s26, 1 }
  0x2c   : > { %4938 = sst [smem:[#allocation51_spill]] %s3716_s23  ;;  %p4898_p4 = scmp.eq.s32.totalorder %s3916_s27, 0 }
  0x2d   : > { %4939 = sst [smem:[#allocation52_spill]] %s3720_s24  ;;  %p447_p5 = scmp.lt.s32.totalorder %s3728_s26, 5 }
  0x2e   : > { %s3731_s29 = smov [#allocation14]   ;;  %s3732_s18 = smov [#allocation17]  }
  0x2f   : > { %p3921_p6 = pnand %p2541_p3, %p447_p5  ;;  %s459_s0 = sshll.u32 %s3731_s29, 4  ;;  %s3925_s0 = int_to_ptr.vmem [resolvable:$true] %s459_s0 }
  0x30   : > { %s483_s19 = sshll.u32 %s3732_s18, 4  ;;  %s3733_s17 = smov [#allocation20]   ;;  %s3935_s19 = int_to_ptr.vmem [resolvable:$true] %s483_s19 }
  0x31   : > { %s4940_s28 = scalar_select %p3921_p6, 1, 0 }
  0x32   : > { %p2866_p7 = pneg %p3921_p6  ;;  %s3937_s24 = sshll.u32 %s3733_s17, 4  ;;  %s508_s24 = int_to_ptr.vmem [resolvable:$true] %s3937_s24 }
  0x33   : > { %4941 = sst [smem:[#allocation53_spill]] %s4940_s28  ;;  %s4943_s4 = sld [smem:[#allocation58_spill]] }
  0x34   : > { %p3931_p8 = pnand %p2866_p7, %p4898_p4 }
  0x36   : > { %s4942_s30 = scalar_select %p3931_p8, 1, 0 }
  0x37   : > { %p3947_p10 = pneg %p3931_p8 }
  0x39   : > { %s3130_s29 = scalar_lea.hbm %s4943_s4, 256 }
  0x3a   : > { %p3131_p9 = scmp.ne.s32.totalorder %s4943_s4, %s3130_s29  ;;  %p3137_p13 = scmp.lt.u32.totalorder %s3130_s29, %s4943_s4 }
  0x3c   : > { %p3133_p11 = pnand %p3947_p10, %p3131_p9 }
  0x3e   : > { %p3134_p12 = pneg %p3133_p11 }
  0x40   : > { %p3139_p0 = pnand %p3137_p13, %p3134_p12 }
  0x42   : > { %3142 = shalt.err (!%p3139_p0)
}
  0x43   : > { %s3143_s21 = scalar_lea.vmem %s3925_s0, 256  ;;  %p3151_p5 = scmp.lt.s32.totalorder %s3925_s0, %s3925_s0 }
  0x44   : > { %p3144_p1 = scmp.ne.s32.totalorder %s3925_s0, %s3143_s21  ;;  %p3152_p7 = scmp.lt.s32.totalorder %s3143_s21, %s3143_s21 }
  0x46   : > { %p3146_p2 = pnand %p3144_p1, %p3947_p10  ;;  %p3153_p9 = por %p3152_p7, %p3151_p5 }
  0x48   : > { %p3147_p3 = pneg %p3146_p2 }
  0x4a   : > { %p3154_p11 = pnand %p3153_p9, %p3147_p3 }
  0x4c   : > { %3157 = shalt.err (!%p3154_p11)
}
  0x4d   : > { %s4900_s22 = smov 64   ;;  %s4902_s23 = smov 4  }
  0x4e   : > { %2869 = dma.hbm_to_vmem [thread:$0]  (!%p3931_p8), %s4943_s4, 256, %s3925_s0, [#allocation15], %s4900_s22, %s4900_s22, %s4902_s23  }
  0x4f   : > { %s4945_s6 = sld [smem:[#allocation60_spill]] }
  0x55   : > { %s3158_s21 = scalar_lea.hbm %s4945_s6, 256 }
  0x56   : > { %p3159_p12 = scmp.ne.s32.totalorder %s4945_s6, %s3158_s21  ;;  %p3165_p1 = scmp.lt.u32.totalorder %s3158_s21, %s4945_s6 }
  0x58   : > { %p3161_p13 = pnand %p3159_p12, %p3947_p10 }
  0x5a   : > { %p3162_p0 = pneg %p3161_p13 }
  0x5c   : > { %p3167_p2 = pnand %p3165_p1, %p3162_p0 }
  0x5e   : > { %3170 = shalt.err (!%p3167_p2)
}
  0x5f   : > { %s3171_s0 = scalar_lea.vmem %s3935_s19, 256  ;;  %p3179_p9 = scmp.lt.s32.totalorder %s3935_s19, %s3935_s19 }
  0x60   : > { %p3172_p3 = scmp.ne.s32.totalorder %s3935_s19, %s3171_s0  ;;  %p3180_p11 = scmp.lt.s32.totalorder %s3171_s0, %s3171_s0 }
  0x62   : > { %p3174_p5 = pnand %p3172_p3, %p3947_p10  ;;  %p3181_p12 = por %p3180_p11, %p3179_p9 }
  0x64   : > { %p3175_p7 = pneg %p3174_p5 }
  0x66   : > { %p3182_p13 = pnand %p3181_p12, %p3175_p7 }
  0x68   : > { %3185 = shalt.err (!%p3182_p13)
}
  0x69   : > { %2875 = dma.hbm_to_vmem [thread:$0]  (!%p3931_p8), %s4945_s6, 256, %s3935_s19, [#allocation18], %s4900_s22, %s4900_s22, %s4902_s23  }
  0x6a   : > { %s4946_s8 = sld [smem:[#allocation62_spill]] }
  0x70   : > { %s3186_s28 = scalar_lea.hbm %s4946_s8, 256 }
  0x71   : > { %p3187_p0 = scmp.ne.s32.totalorder %s4946_s8, %s3186_s28  ;;  %p3193_p3 = scmp.lt.u32.totalorder %s3186_s28, %s4946_s8 }
  0x73   : > { %p3189_p1 = pnand %p3187_p0, %p3947_p10 }
  0x75   : > { %p3190_p2 = pneg %p3189_p1 }
  0x77   : > { %p3195_p5 = pnand %p3193_p3, %p3190_p2 }
  0x79   : > { %3198 = shalt.err (!%p3195_p5)
}
  0x7a   : > { %s3199_s0 = scalar_lea.vmem %s508_s24, 256  ;;  %p3207_p12 = scmp.lt.s32.totalorder %s508_s24, %s508_s24 }
  0x7b   : > { %p3200_p7 = scmp.ne.s32.totalorder %s508_s24, %s3199_s0  ;;  %p3208_p13 = scmp.lt.s32.totalorder %s3199_s0, %s3199_s0 }
  0x7d   : > { %p3202_p9 = pnand %p3200_p7, %p3947_p10  ;;  %p3209_p4 = por %p3208_p13, %p3207_p12 }
  0x7f   : > { %p3203_p11 = pneg %p3202_p9 }
  0x81   : > { %p3210_p6 = pnand %p3209_p4, %p3203_p11 }
  0x83   : > { %3213 = shalt.err (!%p3210_p6)
}
  0x84   : > { %2881 = dma.hbm_to_vmem [thread:$0]  (!%p3931_p8), %s4946_s8, 256, %s508_s24, [#allocation21], %s4900_s22, %s4900_s22, %s4902_s23  }
  0x85   : > { %s3736_s11 = smov [#allocation23]   ;;  %s3737_s15 = smov [#allocation26]  }
  0x86   : > { %s531_s13 = sshll.u32 %s3736_s11, 4  ;;  %s555_s28 = sshll.u32 %s3737_s15, 4  ;;  %s532_s13 = int_to_ptr.vmem [resolvable:$true] %s531_s13  ;;  %s556_s28 = int_to_ptr.vmem [resolvable:$true] %s555_s28 }
  0x87   : > { %s4947_s10 = sld [smem:[#allocation64_spill]] }
  0x8d   : > { %s3214_s17 = scalar_lea.hbm %s4947_s10, 256 }
  0x8e   : > { %p3215_p4 = scmp.ne.s32.totalorder %s4947_s10, %s3214_s17  ;;  %p3221_p1 = scmp.lt.u32.totalorder %s3214_s17, %s4947_s10 }
  0x90   : > { %p3217_p6 = pnand %p3215_p4, %p3947_p10 }
  0x92   : > { %p3218_p0 = pneg %p3217_p6 }
  0x94   : > { %p3223_p2 = pnand %p3221_p1, %p3218_p0 }
  0x96   : > { %3226 = shalt.err (!%p3223_p2)
}
  0x97   : > { %s3227_s24 = scalar_lea.vmem %s532_s13, 256  ;;  %p3235_p9 = scmp.lt.s32.totalorder %s532_s13, %s532_s13 }
  0x98   : > { %p3228_p3 = scmp.ne.s32.totalorder %s532_s13, %s3227_s24  ;;  %p3236_p11 = scmp.lt.s32.totalorder %s3227_s24, %s3227_s24 }
  0x9a   : > { %p3230_p5 = pnand %p3228_p3, %p3947_p10  ;;  %p3237_p12 = por %p3236_p11, %p3235_p9 }
  0x9c   : > { %p3231_p7 = pneg %p3230_p5 }
  0x9e   : > { %p3238_p13 = pnand %p3237_p12, %p3231_p7 }
  0xa0   : > { %3241 = shalt.err (!%p3238_p13)
}
  0xa1   : > { %2887 = dma.hbm_to_vmem [thread:$0]  (!%p3931_p8), %s4947_s10, 256, %s532_s13, [#allocation24], %s4900_s22, %s4900_s22, %s4902_s23  }
  0xa2   : > { %s4948_s12 = sld [smem:[#allocation66_spill]] }
  0xa8   : > { %s3242_s29 = scalar_lea.hbm %s4948_s12, 256 }
  0xa9   : > { %p3243_p4 = scmp.ne.s32.totalorder %s4948_s12, %s3242_s29  ;;  %p3249_p1 = scmp.lt.u32.totalorder %s3242_s29, %s4948_s12 }
  0xab   : > { %p3245_p6 = pnand %p3243_p4, %p3947_p10 }
  0xad   : > { %p3246_p0 = pneg %p3245_p6 }
  0xaf   : > { %p3251_p2 = pnand %p3249_p1, %p3246_p0 }
  0xb1   : > { %3254 = shalt.err (!%p3251_p2)
}
  0xb2   : > { %s3255_s19 = scalar_lea.vmem %s556_s28, 256  ;;  %p3263_p9 = scmp.lt.s32.totalorder %s556_s28, %s556_s28 }
  0xb3   : > { %p3256_p3 = scmp.ne.s32.totalorder %s556_s28, %s3255_s19  ;;  %p3264_p11 = scmp.lt.s32.totalorder %s3255_s19, %s3255_s19 }
  0xb5   : > { %p3258_p5 = pnand %p3256_p3, %p3947_p10  ;;  %p3265_p12 = por %p3264_p11, %p3263_p9 }
  0xb7   : > { %p3259_p7 = pneg %p3258_p5 }
  0xb9   : > { %p3266_p13 = pnand %p3265_p12, %p3259_p7 }
  0xbb   : > { %3269 = shalt.err (!%p3266_p13)
}
  0xbc   : > { %2893 = dma.hbm_to_vmem [thread:$0]  (!%p3931_p8), %s4948_s12, 256, %s556_s28, [#allocation27], %s4900_s22, %s4900_s22, %s4902_s23  }
  0xbd   : > { %s3738_s4 = smov [#allocation29]   ;;  %s4949_s14 = sld [smem:[#allocation68_spill]] }
  0xbe   : > { %s582_s9 = sshll.u32 %s3738_s4, 4  ;;  %s583_s9 = int_to_ptr.vmem [resolvable:$true] %s582_s9 }
  0xc3   : > { %s3270_s29 = scalar_lea.hbm %s4949_s14, 16 }
  0xc4   : > { %p3271_p4 = scmp.ne.s32.totalorder %s4949_s14, %s3270_s29  ;;  %p3277_p1 = scmp.lt.u32.totalorder %s3270_s29, %s4949_s14 }
  0xc6   : > { %p3273_p6 = pnand %p3271_p4, %p3947_p10 }
  0xc8   : > { %p3274_p0 = pneg %p3273_p6 }
  0xca   : > { %p3279_p2 = pnand %p3277_p1, %p3274_p0 }
  0xcc   : > { %3282 = shalt.err (!%p3279_p2)
}
  0xcd   : > { %s3283_s28 = scalar_lea.vmem %s583_s9, 16  ;;  %s3290_s19 = scalar_lea.vmem %s583_s9, 32 }
  0xce   : > { %p3284_p3 = scmp.ne.s32.totalorder %s583_s9, %s3283_s28  ;;  %p3291_p9 = scmp.lt.s32.totalorder %s583_s9, %s583_s9 }
  0xcf   : > { %p3292_p11 = scmp.lt.s32.totalorder %s3290_s19, %s3283_s28 }
  0xd0   : > { %p3286_p5 = pnand %p3284_p3, %p3947_p10 }
  0xd1   : > { %p3293_p12 = por %p3292_p11, %p3291_p9 }
  0xd2   : > { %p3287_p7 = pneg %p3286_p5 }
  0xd4   : > { %p3294_p13 = pnand %p3293_p12, %p3287_p7 }
  0xd6   : > { %3297 = shalt.err (!%p3294_p13)
}
  0xd7   : > { %2899 = dma.hbm_to_vmem [thread:$0]  (!%p3931_p8), %s4949_s14, 16, %s583_s9, [#allocation30]  }
  0xd8   : > { %s59_s4 = sadd.s32 1, %s3724_s25  ;;  %p4905_p4 = scmp.eq.s32.totalorder %s3728_s26, 0 }
  0xd9   : > { %p61_p6 = scmp.ge.s32.totalorder %s59_s4, 4  ;;  %s89_s11 = sld [smem:[#allocation7 + %s3724_s25]] }
  0xda   : > { %s96_s15 = sadd.s32 1, %s3704_s20  ;;  %p103_p0 = scmp.ne.s32.totalorder %s3704_s20, %s3700_s1 }
  0xdb   : > { %s5017_s4 = smov (%p61_p6, %s59_s4), 0  ;;  %p109_p2 = scmp.ne.s32.totalorder %s3700_s1, %s3696_s3 }
  0xdc   : > { %p4089_p1 = por %p103_p0, %p4905_p4  ;;  %s90_s9 = sld [smem:[#allocation7 + %s5017_s4]] }
  0xdd   : > { %p4904_p3 = scmp.lt.s32.totalorder %s3728_s26, 4  ;;  %p4951_p5 = scmp.eq.s32.totalorder %s3916_s27, 0 }
  0xde   : > { %s640_s21 = sand.u32 1, %s3704_s20   ;;  %s4954_s5 = sld [smem:[#allocation59_spill]] }
  0xdf   : > { %p4099_p7 = por %p109_p2, %p4951_p5  ;;  %s2559_s0 = sshll.u32 %s640_s21, 4 }
  0xe0   : > { %p4109_p9 = pnand %p4904_p3, %p4089_p1  ;;  %s642_s3 = scalar_lea.vmem [#allocation11], %s2559_s0 }
  0xe1   : > { %s4952_s18 = scalar_select %p4099_p7, 1, 0 }
  0xe2   : > { %s4953_s28 = scalar_select %p4109_p9, 1, 0 }
  0xe3   : > { %s91_s19 = ssub.s32 %s89_s11, %s90_s9  ;;  %s652_s13 = sshll.u32 %s642_s3, 4  ;;  %s4113_s13 = int_to_ptr.vmem [resolvable:$true] %s652_s13 }
  0xe4   : > { %p94_p11 = scmp.eq.s32.totalorder %s91_s19, 0  ;;  %s3739_s21 = smov [#allocation16]  }
  0xe5   : > { %s2831_s24 = scalar_select %p4089_p1, [#allocation7], [#allocation35] }
  0xe6   : > { %s4118_s22 = scalar_select %p94_p11, %s3704_s20, %s96_s15  }
  0xe7   : > { %s2832_s23 = scalar_select %p4089_p1, %s3724_s25, 0 }
  0xe8   : > { %s5019_s24 = smov (!%p4904_p3, %s2831_s24), [#allocation36]  ;;  %s473_s17 = sshll.u32 %s3739_s21, 4  ;;  %s474_s17 = int_to_ptr.vmem [resolvable:$true] %s473_s17 }
  0xe9   : > { %s5021_s23 = smov (!%p4904_p3, %s2832_s23), 0  ;;  %s3298_s0 = scalar_lea.hbm %s4954_s5, 16 }
  0xea   : > { %s4127_s6 = sld [smem:[%s5019_s24 + %s5021_s23]]  ;;  %p3299_p12 = scmp.ne.s32.totalorder %s4954_s5, %s3298_s0 }
  0xeb   : > { %p3305_p0 = scmp.lt.u32.totalorder %s3298_s0, %s4954_s5 }
  0xec   : > { %p3301_p13 = pnand %p3299_p12, %p3947_p10 }
  0xee   : > { %p3302_p6 = pneg %p3301_p13 }
  0xf0   : > { %p3307_p1 = pnand %p3305_p0, %p3302_p6 }
  0xf2   : > { %3310 = shalt.err (!%p3307_p1)
}
  0xf3   : > { %s3311_s23 = scalar_lea.vmem %s474_s17, 16  ;;  %s3318_s24 = scalar_lea.vmem %s474_s17, 32 }
  0xf4   : > { %p3312_p2 = scmp.ne.s32.totalorder %s474_s17, %s3311_s23  ;;  %p3319_p3 = scmp.lt.s32.totalorder %s474_s17, %s474_s17 }
  0xf5   : > { %p3320_p4 = scmp.lt.s32.totalorder %s3318_s24, %s3311_s23 }
  0xf6   : > { %p3314_p5 = pnand %p3312_p2, %p3947_p10 }
  0xf7   : > { %p3321_p7 = por %p3320_p4, %p3319_p3 }
  0xf8   : > { %p3315_p11 = pneg %p3314_p5 }
  0xfa   : > { %p3322_p9 = pnand %p3321_p7, %p3315_p11 }
  0xfc   : > { %3325 = shalt.err (!%p3322_p9)
}
  0xfd   : > { %2872 = dma.hbm_to_vmem [thread:$0]  (!%p3931_p8), %s4954_s5, 16, %s474_s17, [#allocation15]  }
  0xfe   : > { %s3740_s9 = smov [#allocation19]   ;;  %s3741_s19 = smov [#allocation22]  }
  0xff   : > { %s497_s0 = sshll.u32 %s3740_s9, 4  ;;  %s521_s3 = sshll.u32 %s3741_s19, 4  ;;  %s498_s0 = int_to_ptr.vmem [resolvable:$true] %s497_s0  ;;  %s4147_s3 = int_to_ptr.vmem [resolvable:$true] %s521_s3 }
 0x100   : > { %s4955_s7 = sld [smem:[#allocation61_spill]] }
 0x106   : > { %s3326_s23 = scalar_lea.hbm %s4955_s7, 16 }
 0x107   : > { %p3327_p4 = scmp.ne.s32.totalorder %s4955_s7, %s3326_s23  ;;  %p3333_p9 = scmp.lt.u32.totalorder %s3326_s23, %s4955_s7 }
 0x109   : > { %p3329_p3 = pnand %p3327_p4, %p3947_p10 }
 0x10b   : > { %p3330_p7 = pneg %p3329_p3 }
 0x10d   : > { %p3335_p12 = pnand %p3333_p9, %p3330_p7 }
 0x10f   : > { %3338 = shalt.err (!%p3335_p12)
}
 0x110   : > { %s3339_s11 = scalar_lea.vmem %s498_s0, 16  ;;  %s3346_s9 = scalar_lea.vmem %s498_s0, 32 }
 0x111   : > { %p3340_p13 = scmp.ne.s32.totalorder %s498_s0, %s3339_s11  ;;  %p3347_p1 = scmp.lt.s32.totalorder %s498_s0, %s498_s0 }
 0x112   : > { %p3348_p2 = scmp.lt.s32.totalorder %s3346_s9, %s3339_s11 }
 0x113   : > { %p3342_p6 = pnand %p3340_p13, %p3947_p10 }
 0x114   : > { %p3349_p5 = por %p3348_p2, %p3347_p1 }
 0x115   : > { %p3343_p0 = pneg %p3342_p6 }
 0x117   : > { %p3350_p11 = pnand %p3349_p5, %p3343_p0 }
 0x119   : > { %3353 = shalt.err (!%p3350_p11)
}
 0x11a   : > { %2878 = dma.hbm_to_vmem [thread:$0]  (!%p3931_p8), %s4955_s7, 16, %s498_s0, [#allocation18]  }
 0x11b   : > { %s2629_s15 = sshll.u32 %s4127_s6, 8  ;;  %s4956_s2 = sld [smem:[#allocation56_spill]] }
 0x11c   : > { %s3742_s21 = smov [#allocation25]   ;;  %s4957_s11 = sand.u32 1, %s3728_s26  }
 0x11d   : > { %s4173_s17 = sshll.u32 %s3742_s21, 4  ;;  %s4177_s9 = scalar_lea.sflag [#allocation12], %s4957_s11  ;;  %s546_s17 = int_to_ptr.vmem [resolvable:$true] %s4173_s17 }
 0x11e   : > { %p4958_p3 = scmp.ne.s32.totalorder %s4953_s28, 0 }
 0x120   : > { %p3356_p7 = pneg %p4958_p3 }
 0x121   : > { %s4171_s24 = scalar_lea.hbm %s4956_s2, %s2629_s15  ;;  %s3359_s19 = scalar_lea.hbm %s4956_s2, 1024 }
 0x122   : > { %s3354_s8 = scalar_lea.hbm %s4171_s24, 256  ;;  %p3360_p13 = scmp.lt.u32.totalorder %s4171_s24, %s4956_s2 }
 0x123   : > { %p3355_p4 = scmp.ne.s32.totalorder %s4171_s24, %s3354_s8  ;;  %p3361_p6 = scmp.lt.u32.totalorder %s3359_s19, %s3354_s8 }
 0x124   : > { %p3363_p1 = scmp.lt.u32.totalorder %s3354_s8, %s4171_s24 }
 0x125   : > { %p3357_p9 = pnand %p3356_p7, %p3355_p4  ;;  %p3362_p0 = por %p3361_p6, %p3360_p13 }
 0x127   : > { %p3358_p12 = pneg %p3357_p9  ;;  %p3364_p2 = por %p3363_p1, %p3362_p0 }
 0x129   : > { %p3365_p5 = pnand %p3364_p2, %p3358_p12 }
 0x12b   : > { %3368 = shalt.err (!%p3365_p5)
}
 0x12c   : > { %s3369_s23 = scalar_lea.vmem %s4113_s13, 256  ;;  %s3743_s21 = smov [#allocation11]  }
 0x12d   : > { %p3370_p11 = scmp.ne.s32.totalorder %s4113_s13, %s3369_s23  ;;  %s3374_s11 = sshll.u32 %s3743_s21, 4  ;;  %s3375_s11 = int_to_ptr.vmem [resolvable:$false] %s3374_s11 }
 0x12e   : > { %s3376_s6 = scalar_lea.vmem %s3375_s11, 512  ;;  %p3377_p8 = scmp.lt.s32.totalorder %s4113_s13, %s3375_s11 }
 0x12f   : > { %p3372_p4 = pnand %p3370_p11, %p3356_p7  ;;  %p3378_p13 = scmp.lt.s32.totalorder %s3376_s6, %s3369_s23 }
 0x131   : > { %p3373_p9 = pneg %p3372_p4  ;;  %p3379_p6 = por %p3378_p13, %p3377_p8 }
 0x133   : > { %p3380_p0 = pnand %p3379_p6, %p3373_p9 }
 0x135   : > { %3383 = shalt.err (!%p3380_p0)
}
 0x136   : > { %s4910_s8 = smov 128   ;;  %s4911_s0 = smov 8  }
 0x137   : > { %2914 = dma.hbm_to_vmem [thread:$0]  (!%p4958_p3), %s4171_s24, 256, %s4113_s13, %s4177_s9, %s4910_s8, %s4910_s8, %s4911_s0  }
 0x138   : > { %s4959_s29 = sld [smem:[#allocation63_spill]] }
 0x13e   : > { %s3384_s21 = scalar_lea.hbm %s4959_s29, 16 }
 0x13f   : > { %p3385_p8 = scmp.ne.s32.totalorder %s4959_s29, %s3384_s21  ;;  %p3391_p1 = scmp.lt.u32.totalorder %s3384_s21, %s4959_s29 }
 0x141   : > { %p3387_p7 = pnand %p3385_p8, %p3947_p10 }
 0x143   : > { %p3388_p12 = pneg %p3387_p7 }
 0x145   : > { %p3393_p2 = pnand %p3391_p1, %p3388_p12 }
 0x147   : > { %3396 = shalt.err (!%p3393_p2)
}
 0x148   : > { %s3397_s28 = scalar_lea.vmem %s4147_s3, 16  ;;  %s3404_s13 = scalar_lea.vmem %s4147_s3, 32 }
 0x149   : > { %p3398_p3 = scmp.ne.s32.totalorder %s4147_s3, %s3397_s28  ;;  %p3405_p4 = scmp.lt.s32.totalorder %s4147_s3, %s4147_s3 }
 0x14a   : > { %p3406_p9 = scmp.lt.s32.totalorder %s3404_s13, %s3397_s28 }
 0x14b   : > { %p3400_p5 = pnand %p3398_p3, %p3947_p10 }
 0x14c   : > { %p3407_p13 = por %p3406_p9, %p3405_p4 }
 0x14d   : > { %p3401_p11 = pneg %p3400_p5 }
 0x14f   : > { %p3408_p6 = pnand %p3407_p13, %p3401_p11 }
 0x151   : > { %3411 = shalt.err (!%p3408_p6)
}
 0x152   : > { %p4960_p0 = scmp.ne.s32.totalorder %s4942_s30, 0  ;;  %s4961_s21 = sld [smem:[#allocation65_spill]] }
 0x154   : > { %2884 = dma.hbm_to_vmem [thread:$0]  (!%p4960_p0), %s4959_s29, 16, %s4147_s3, [#allocation21]  }
 0x158   : > { %s4962_s11 = smov %s4961_s21  ;;  %s3412_s23 = scalar_lea.hbm %s4961_s21, 16 }
 0x159   : > { %p3413_p8 = scmp.ne.s32.totalorder %s4962_s11, %s3412_s23  ;;  %p3419_p1 = scmp.lt.u32.totalorder %s3412_s23, %s4962_s11 }
 0x15b   : > { %p3415_p7 = pnand %p3413_p8, %p3947_p10 }
 0x15d   : > { %p3416_p12 = pneg %p3415_p7 }
 0x15f   : > { %p3421_p2 = pnand %p3419_p1, %p3416_p12 }
 0x161   : > { %3424 = shalt.err (!%p3421_p2)
}
 0x162   : > { %s3425_s2 = scalar_lea.vmem %s546_s17, 16  ;;  %s3432_s3 = scalar_lea.vmem %s546_s17, 32 }
 0x163   : > { %p3426_p3 = scmp.ne.s32.totalorder %s546_s17, %s3425_s2  ;;  %p3433_p4 = scmp.lt.s32.totalorder %s546_s17, %s546_s17 }
 0x164   : > { %p3434_p9 = scmp.lt.s32.totalorder %s3432_s3, %s3425_s2 }
 0x165   : > { %p3428_p5 = pnand %p3426_p3, %p3947_p10 }
 0x166   : > { %p3435_p13 = por %p3434_p9, %p3433_p4 }
 0x167   : > { %p3429_p11 = pneg %p3428_p5 }
 0x169   : > { %p3436_p6 = pnand %p3435_p13, %p3429_p11 }
 0x16b   : > { %3439 = shalt.err (!%p3436_p6)
}
 0x16c   : > { %2890 = dma.hbm_to_vmem [thread:$0]  (!%p4960_p0), %s4962_s11, 16, %s546_s17, [#allocation24]  }
 0x16d   : > { %s3746_s19 = smov [#allocation28]   ;;  %s3747_s21 = smov [#allocation31]  }
 0x16e   : > { %s568_s15 = sshll.u32 %s3746_s19, 4  ;;  %s592_s23 = sshll.u32 %s3747_s21, 4  ;;  %s569_s15 = int_to_ptr.vmem [resolvable:$true] %s568_s15  ;;  %s593_s23 = int_to_ptr.vmem [resolvable:$true] %s592_s23 }
 0x16f   : > { %s4963_s13 = sld [smem:[#allocation67_spill]] }
 0x175   : > { %s3440_s0 = scalar_lea.hbm %s4963_s13, 256 }
 0x176   : > { %p3441_p8 = scmp.ne.s32.totalorder %s4963_s13, %s3440_s0  ;;  %p3447_p1 = scmp.lt.u32.totalorder %s3440_s0, %s4963_s13 }
 0x178   : > { %p3443_p7 = pnand %p3441_p8, %p3947_p10 }
 0x17a   : > { %p3444_p12 = pneg %p3443_p7 }
 0x17c   : > { %p3449_p2 = pnand %p3447_p1, %p3444_p12 }
 0x17e   : > { %3452 = shalt.err (!%p3449_p2)
}
 0x17f   : > { %s3453_s17 = scalar_lea.vmem %s569_s15, 256  ;;  %p3461_p4 = scmp.lt.s32.totalorder %s569_s15, %s569_s15 }
 0x180   : > { %p3454_p3 = scmp.ne.s32.totalorder %s569_s15, %s3453_s17  ;;  %p3462_p9 = scmp.lt.s32.totalorder %s3453_s17, %s3453_s17 }
 0x182   : > { %p3456_p5 = pnand %p3454_p3, %p3947_p10  ;;  %p3463_p13 = por %p3462_p9, %p3461_p4 }
 0x184   : > { %p3457_p11 = pneg %p3456_p5 }
 0x186   : > { %p3464_p6 = pnand %p3463_p13, %p3457_p11 }
 0x188   : > { %3467 = shalt.err (!%p3464_p6)
}
 0x189   : > { %s4964_s24 = smov 4   ;;  %s4965_s19 = smov 64  }
 0x18a   : > { %2896 = dma.hbm_to_vmem [thread:$0]  (!%p4960_p0), %s4963_s13, 256, %s569_s15, [#allocation27], %s4965_s19, %s4965_s19, %s4964_s24  }
 0x18b   : > { %s4966_s28 = sld [smem:[#allocation69_spill]] }
 0x191   : > { %s3468_s2 = scalar_lea.hbm %s4966_s28, 512 }
 0x192   : > { %p3469_p8 = scmp.ne.s32.totalorder %s4966_s28, %s3468_s2  ;;  %p3475_p1 = scmp.lt.u32.totalorder %s3468_s2, %s4966_s28 }
 0x194   : > { %p3471_p7 = pnand %p3469_p8, %p3947_p10 }
 0x196   : > { %p3472_p12 = pneg %p3471_p7 }
 0x198   : > { %p3477_p2 = pnand %p3475_p1, %p3472_p12 }
 0x19a   : > { %3480 = shalt.err (!%p3477_p2)
}
 0x19b   : > { %s3481_s5 = scalar_lea.vmem %s593_s23, 512  ;;  %p3489_p4 = scmp.lt.s32.totalorder %s593_s23, %s593_s23 }
 0x19c   : > { %p3482_p3 = scmp.ne.s32.totalorder %s593_s23, %s3481_s5  ;;  %p3490_p9 = scmp.lt.s32.totalorder %s3481_s5, %s3481_s5 }
 0x19e   : > { %p3484_p5 = pnand %p3482_p3, %p3947_p10  ;;  %p3491_p13 = por %p3490_p9, %p3489_p4 }
 0x1a0   : > { %p3485_p11 = pneg %p3484_p5 }
 0x1a2   : > { %p3492_p6 = pnand %p3491_p13, %p3485_p11 }
 0x1a4   : > { %3495 = shalt.err (!%p3492_p6)
}
 0x1a5   : > { %2902 = dma.hbm_to_vmem [thread:$0]  (!%p4960_p0), %s4966_s28, 512, %s593_s23, [#allocation30], %s4965_s19, %s4965_s19, %s4964_s24  }
 0x1a6   : > { %s3748_s0 = smov [#allocation32]   ;;  %s4967_s3 = sld [smem:[#allocation70_spill]] }
 0x1a7   : > { %s606_s21 = sshll.u32 %s3748_s0, 4  ;;  %s607_s21 = int_to_ptr.vmem [resolvable:$true] %s606_s21 }
 0x1ac   : > { %s4968_s8 = smov %s4967_s3  ;;  %s3496_s17 = scalar_lea.hbm %s4967_s3, 16 }
 0x1ad   : > { %p3497_p8 = scmp.ne.s32.totalorder %s4968_s8, %s3496_s17  ;;  %p3503_p1 = scmp.lt.u32.totalorder %s3496_s17, %s4968_s8 }
 0x1af   : > { %p3499_p7 = pnand %p3497_p8, %p3947_p10 }
 0x1b1   : > { %p3500_p12 = pneg %p3499_p7 }
 0x1b3   : > { %p3505_p2 = pnand %p3503_p1, %p3500_p12 }
 0x1b5   : > { %3508 = shalt.err (!%p3505_p2)
}
 0x1b6   : > { %s3509_s23 = scalar_lea.vmem %s607_s21, 16  ;;  %s3516_s24 = scalar_lea.vmem %s607_s21, 32 }
 0x1b7   : > { %p3510_p3 = scmp.ne.s32.totalorder %s607_s21, %s3509_s23  ;;  %p3517_p4 = scmp.lt.s32.totalorder %s607_s21, %s607_s21 }
 0x1b8   : > { %p3518_p9 = scmp.lt.s32.totalorder %s3516_s24, %s3509_s23 }
 0x1b9   : > { %p3512_p5 = pnand %p3510_p3, %p3947_p10 }
 0x1ba   : > { %p3519_p13 = por %p3518_p9, %p3517_p4 }
 0x1bb   : > { %p3513_p11 = pneg %p3512_p5 }
 0x1bd   : > { %p3520_p6 = pnand %p3519_p13, %p3513_p11 }
 0x1bf   : > { %3523 = shalt.err (!%p3520_p6)
}
 0x1c0   : > { %s4969_s12 = sld [smem:[#allocation51_spill]]  ;;  %s4970_s11 = sld [smem:[#allocation50_spill]] }
 0x1c1   : > { %s4971_s16 = sld [smem:[#allocation49_spill]]  ;;  %s2540_s7 = sadd.s32 4294967294, %s3728_s26  }
 0x1c2   : > { %2905 = dma.hbm_to_vmem [thread:$0]  (!%p4960_p0), %s4968_s8, 16, %s607_s21, [#allocation33]  }
 0x1c3   : > { %s63_s30 = ssub.s32 %s3724_s25, %s5017_s4  ;;  %p4972_p12 = scmp.eq.s32.totalorder %s3728_s26, 0 }
 0x1c4   : > { %p64_p10 = scmp.eq.s32.totalorder %s63_s30, 0  ;;  %p4973_p2 = scmp.eq.s32.totalorder %s3916_s27, 0 }
 0x1c5   : > { %p434_p5 = scmp.eq.s32.totalorder %s3916_s27, 3  ;;  %p440_p11 = scmp.eq.s32.totalorder %s2540_s7, 3 }
 0x1c6   : > { %s66_s15 = sadd.s32 1, %s4969_s12  ;;  %p73_p8 = scmp.ne.s32.totalorder %s4969_s12, %s4970_s11 }
 0x1c7   : > { %p79_p7 = scmp.ne.s32.totalorder %s4970_s11, %s4971_s16  ;;  %s4332_s2 = sand.u32 1, %s4969_s12  }
 0x1c8   : > { %s4320_s0 = scalar_select %p64_p10, %s4969_s12, %s66_s15  }
 0x1c9   : > { %p75_p1 = por %p4972_p12, %p73_p8  ;;  %p4326_p3 = por %p4973_p2, %p79_p7 }
 0x1ca   : > { %s2628_s21 = sshll.u32 %s3724_s25, 8  ;;  %p4335_p0 = por %p434_p5, %p73_p8 }
 0x1cb   : > { %p4339_p4 = por %p440_p11, %p79_p7  ;;  %s2556_s5 = sshll.u32 %s4332_s2, 4 }
 0x1cc   : > { %s4975_s3 = scalar_select %p4335_p0, 1, 0 }
 0x1cd   : > { %s4976_s17 = scalar_select %p4339_p4, 1, 0 }
 0x1ce   : > { %s4977_s10 = sld [smem:[#allocation55_spill]]  ;;  %s621_s12 = scalar_lea.vmem [#allocation8], %s2556_s5 }
 0x1cf   : > { %s628_s11 = sshll.u32 %s621_s12, 4  ;;  %p4978_p9 = scmp.lt.s32.totalorder %s3728_s26, 4  ;;  %s4355_s11 = int_to_ptr.vmem [resolvable:$true] %s628_s11 }
 0x1d0   : > { %s618_s30 = scalar_lea.sflag [#allocation9], %s4332_s2 }
 0x1d1   : > { %p4351_p13 = pnand %p4978_p9, %p75_p1 }
 0x1d3   : > { %p3526_p10 = pneg %p4351_p13 }
 0x1d4   : > { %s4347_s19 = scalar_lea.hbm %s4977_s10, %s2628_s21  ;;  %s3529_s23 = scalar_lea.hbm %s4977_s10, 1024 }
 0x1d5   : > { %s3524_s15 = scalar_lea.hbm %s4347_s19, 256  ;;  %p3530_p12 = scmp.lt.u32.totalorder %s4347_s19, %s4977_s10 }
 0x1d6   : > { %p3525_p6 = scmp.ne.s32.totalorder %s4347_s19, %s3524_s15  ;;  %p3531_p1 = scmp.lt.u32.totalorder %s3529_s23, %s3524_s15 }
 0x1d7   : > { %p3533_p5 = scmp.lt.u32.totalorder %s3524_s15, %s4347_s19 }
 0x1d8   : > { %p3527_p8 = pnand %p3526_p10, %p3525_p6  ;;  %p3532_p2 = por %p3531_p1, %p3530_p12 }
 0x1da   : > { %p3528_p7 = pneg %p3527_p8  ;;  %p3534_p11 = por %p3533_p5, %p3532_p2 }
 0x1dc   : > { %p3535_p9 = pnand %p3534_p11, %p3528_p7 }
 0x1de   : > { %3538 = shalt.err (!%p3535_p9)
}
 0x1df   : > { %s3539_s7 = scalar_lea.vmem %s4355_s11, 256  ;;  %s3749_s21 = smov [#allocation8]  }
 0x1e0   : > { %p3540_p6 = scmp.ne.s32.totalorder %s4355_s11, %s3539_s7  ;;  %s3544_s5 = sshll.u32 %s3749_s21, 4  ;;  %s3545_s5 = int_to_ptr.vmem [resolvable:$false] %s3544_s5 }
 0x1e1   : > { %s3546_s24 = scalar_lea.vmem %s3545_s5, 512  ;;  %p3547_p0 = scmp.lt.s32.totalorder %s4355_s11, %s3545_s5 }
 0x1e2   : > { %p3542_p8 = pnand %p3540_p6, %p3526_p10  ;;  %p3548_p12 = scmp.lt.s32.totalorder %s3546_s24, %s3539_s7 }
 0x1e4   : > { %p3543_p4 = pneg %p3542_p8  ;;  %p3549_p1 = por %p3548_p12, %p3547_p0 }
 0x1e6   : > { %p3550_p2 = pnand %p3549_p1, %p3543_p4 }
 0x1e8   : > { %3553 = shalt.err (!%p3550_p2)
}
 0x1e9   : > { %s4980_s15 = smov 8   ;;  %s4981_s23 = smov 128  }
 0x1ea   : > { %2909 = dma.hbm_to_vmem [thread:$0]  (!%p4351_p13), %s4347_s19, 256, %s4355_s11, %s618_s30, %s4981_s23, %s4981_s23, %s4980_s15  }
 0x1eb   : > { %s2630_s12 = sshll.u32 %s3724_s25, 6  ;;  %s4982_s21 = sshll.u32 %s4332_s2, 2 }
 0x1ec   : > { %s666_s5 = scalar_lea.vmem [#allocation13], %s4982_s21  ;;  %s4983_s10 = sld [smem:[#allocation57_spill]] }
 0x1ed   : > { %s674_s7 = sshll.u32 %s666_s5, 4  ;;  %s4397_s7 = int_to_ptr.vmem [resolvable:$true] %s674_s7 }
 0x1f2   : > { %s4395_s13 = scalar_lea.hbm %s4983_s10, %s2630_s12  ;;  %s3559_s11 = scalar_lea.hbm %s4983_s10, 256 }
 0x1f3   : > { %s3554_s14 = scalar_lea.hbm %s4395_s13, 64  ;;  %p3560_p5 = scmp.lt.u32.totalorder %s4395_s13, %s4983_s10 }
 0x1f4   : > { %p3555_p0 = scmp.ne.s32.totalorder %s4395_s13, %s3554_s14  ;;  %p3561_p11 = scmp.lt.u32.totalorder %s3559_s11, %s3554_s14 }
 0x1f5   : > { %p3563_p6 = scmp.lt.u32.totalorder %s3554_s14, %s4395_s13 }
 0x1f6   : > { %p3557_p4 = pnand %p3555_p0, %p3526_p10  ;;  %p3562_p9 = por %p3561_p11, %p3560_p5 }
 0x1f8   : > { %p3558_p7 = pneg %p3557_p4  ;;  %p3564_p8 = por %p3563_p6, %p3562_p9 }
 0x1fa   : > { %p3565_p12 = pnand %p3564_p8, %p3558_p7 }
 0x1fc   : > { %3568 = shalt.err (!%p3565_p12)
}
 0x1fd   : > { %s3569_s15 = scalar_lea.vmem %s4397_s7, 64  ;;  %s3750_s23 = smov [#allocation13]  }
 0x1fe   : > { %p3570_p1 = scmp.ne.s32.totalorder %s4397_s7, %s3569_s15  ;;  %s3574_s12 = sshll.u32 %s3750_s23, 4  ;;  %s3575_s12 = int_to_ptr.vmem [resolvable:$false] %s3574_s12 }
 0x1ff   : > { %s3576_s21 = scalar_lea.vmem %s3575_s12, 128  ;;  %p3577_p4 = scmp.lt.s32.totalorder %s4397_s7, %s3575_s12 }
 0x200   : > { %p3572_p2 = pnand %p3570_p1, %p3526_p10  ;;  %p3578_p5 = scmp.lt.s32.totalorder %s3576_s21, %s3569_s15 }
 0x202   : > { %p3573_p0 = pneg %p3572_p2  ;;  %p3579_p11 = por %p3578_p5, %p3577_p4 }
 0x204   : > { %p3580_p9 = pnand %p3579_p11, %p3573_p0 }
 0x206   : > { %3583 = shalt.err (!%p3580_p9)
}
 0x207   : > { %s3751_s14 = smov 32   ;;  %s3752_s5 = smov 2  }
 0x208   : > { %2917 = dma.hbm_to_vmem [thread:$0]  (!%p4351_p13), %s4395_s13, 64, %s4397_s7, %s4177_s9, %s3751_s14, %s3751_s14, %s3752_s5  }
 0x209   : > { %s4984_s24 = sld [smem:[#allocation53_spill]] }
 0x20f   : > { %p4985_p10 = scmp.ne.s32.totalorder %s4984_s24, 0 }
 0x210   : > { %s4986_s2 = sld [smem:[#allocation50_spill]] (!%p4985_p10) }
 0x211   : > { %686 = sbr.rel (%p4985_p10) target bundleno = 2660 (0xa64), region = 84 }
 0x216   : > { %s4426_s19 = sand.u32 (!%p4985_p10), 1, %s4986_s2  }
 0x217   : > { %s2566_s11 = sshll.u32 (!%p4985_p10), %s4426_s19, 4  ;;  %s689_s30 = scalar_lea.sflag (!%p4985_p10), [#allocation9], %s4426_s19 }
 0x218   : > { %s4432_s8 = scalar_lea.vmem [#allocation8], %s2566_s11 }
 0x219   : > { %3651 = dma.done.wait (%p4326_p3), %s689_s30, 256  }
 0x21a   : > { %3653 = vsyncadd (%p4326_p3), %s689_s30, 4294967040  ;;  %s697_s9 = sand.u32 1, %s3916_s27   ;;  %s699_s13 = sand.u32 1, %s3700_s1  }
 0x21b   : > { %s4440_s16 = sshll.u32 %s699_s13, 4  ;;  %s698_s7 = scalar_lea.sflag [#allocation12], %s697_s9 }
 0x21c   : > { %s701_s15 = scalar_lea.vmem [#allocation11], %s4440_s16  ;;  %p4987_p13 = scmp.ne.s32.totalorder %s4952_s18, 0 }
 0x21e   : > { %3655 = dma.done.wait (%p4987_p13), %s698_s7, 256  }
 0x21f   : > { %3657 = vsyncadd (%p4987_p13), %s698_s7, 4294967040  ;;  %s2568_s23 = sshll.u32 %s4426_s19, 2 }
 0x220   : > { %s4448_s12 = scalar_lea.vmem [#allocation13], %s2568_s23 }
 0x221   : > { %3659 = dma.done.wait (%p4326_p3), %s698_s7, 64  }
 0x222   : > { %3661 = vsyncadd (%p4326_p3), %s698_s7, 4294967232  ;;  %p4988_p7 = scmp.eq.s32.totalorder %s3916_s27, 0 }
 0x224   : > { %3663 = dma.done.wait (%p4988_p7), [#allocation15], 272   ;;  %p4989_p6 = pmov %p4988_p7 }
 0x226   : > { %3665 = vsyncadd (%p4989_p6), [#allocation15], 4294967024  ;;  %p4990_p8 = pmov %p4989_p6 }
 0x227   : > { %p4991_p12 = pmov %p4989_p6 }
 0x228   : > { %3667 = dma.done.wait (%p4990_p8), [#allocation18], 272  }
 0x229   : > { %3669 = vsyncadd (%p4991_p12), [#allocation18], 4294967024  ;;  %p4992_p1 = pmov %p4989_p6 }
 0x22b   : > { %3671 = dma.done.wait (%p4992_p1), [#allocation21], 272   ;;  %p4993_p2 = pmov %p4992_p1 }
 0x22c   : > { %p4994_p3 = pmov %p4992_p1 }
 0x22d   : > { %3673 = vsyncadd (%p4993_p2), [#allocation21], 4294967024 }
 0x22e   : > { %3675 = dma.done.wait (%p4994_p3), [#allocation24], 272   ;;  %p4995_p0 = pmov %p4992_p1 }
 0x230   : > { %3677 = vsyncadd (%p4995_p0), [#allocation24], 4294967024  ;;  %p4996_p4 = pmov %p4995_p0 }
 0x231   : > { %p4997_p5 = pmov %p4995_p0 }
 0x232   : > { %3679 = dma.done.wait (%p4996_p4), [#allocation27], 512  }
 0x233   : > { %3681 = vsyncadd (%p4997_p5), [#allocation27], 4294966784  ;;  %p4998_p11 = pmov %p4995_p0 }
 0x234   : > { %p4999_p9 = pmov %p4995_p0 }
 0x235   : > { %3683 = dma.done.wait (%p4998_p11), [#allocation30], 528  }
 0x236   : > { %3685 = vsyncadd (%p4999_p9), [#allocation30], 4294966768  ;;  %p5000_p10 = pmov %p4995_p0 }
 0x237   : > { %p5001_p13 = pmov %p4995_p0 }
 0x238   : > { %3687 = dma.done.wait (%p5000_p10), [#allocation33], 16  }
 0x239   : > { %3689 = vsyncadd (%p5001_p13), [#allocation33], 4294967280  ;;  %vm854_vm0 = vcmask 261120   ;;  %v3753_v0 = vmov 0.0   ;;  %vm3754_vm1 = vmmov 0   ;;  %v3076_v1 = vld [vmem:[#allocation14] sm:$0xff]  }
 0x23a   : > { %2680 = vmatprep.subr.bf16.mxu0 %v3753_v0  ;;  %2688 = vmatprep.subr.bf16.mxu1 %v3753_v0  ;;  %906 = vst.msk [vmem:[#allocation5] sm:$0xff] %vm854_vm0, %v3753_v0  ;;  %907 = vst.msk [vmem:[#allocation5 + $0x8] sm:$0xff] %vm854_vm0, %v3753_v0  ;;  %v3077_v2 = vld [vmem:[#allocation17] sm:$0xff]   ;;  %v3078_v3 = vld [vmem:[#allocation14 + $0x8] sm:$0xff]   ;;  %vm1056_vm2 = vcmask 64512   ;;  %s3755_s27 = smov 112  }
 0x23b   : > { %2684 = vmatprep.mubr.msk.bf16.mxu0 %vm3754_vm1, %v3753_v0  ;;  %2692 = vmatprep.mubr.msk.bf16.mxu1 %vm3754_vm1, %v3753_v0  ;;  %v3079_v4 = vld [vmem:[#allocation17 + $0x8] sm:$0xff]   ;;  %v2583_v11 = vld [vmem:[#allocation16] ss:$0 sm:$0xff]  ;;  %v2587_v13 = vld [vmem:[#allocation19] ss:$0 sm:$0xff]  ;;  %s3756_s18 = smov 120  }
 0x23c   : > { %2681 = vmatpush3.bf16.msra.mxu0 %v3076_v1  ;;  %2689 = vmatpush3.bf16.msra.mxu1 %v3077_v2  ;;  %v828_v5 = vld [vmem:[%s4432_s8] sm:$0xff]  ;;  %v829_v6 = vld [vmem:[%s4432_s8 + $0x8] sm:$0xff]  ;;  %s3757_s6 = smov 104   ;;  %vm1106_vm3 = vcmask 130048   ;;  %vm901_vm4 = vcmask 31744   ;;  %v3758_v57 = vmov -inf  }
 0x23d   : > { %2682 = vmatprep.subr.bf16.mxu0 %v3753_v0  ;;  %2690 = vmatprep.subr.bf16.mxu1 %v3753_v0  ;;  %v908_v7 = vld [vmem:[%s701_s15] sm:$0xff]  ;;  %v830_v8 = vpack.c.bf16 %v829_v6, %v828_v5  ;;  %v909_v9 = vld [vmem:[%s701_s15 + $0x8] sm:$0xff]  ;;  %902 = vst.msk [vmem:[#allocation3] sm:$0xff] %vm901_vm4, %v3758_v57  ;;  %903 = vst.msk [vmem:[#allocation3 + $0x8] sm:$0xff] %vm901_vm4, %v3758_v57  ;;  %v3759_v58 = vmov 0   ;;  %vm1151_vm5 = vcmask 7168  }
 0x23e   : > { %v910_v10 = vpack.c.bf16 %v909_v9, %v908_v7  ;;  %v3080_v29 = vld [vmem:[#allocation20] sm:$0xff]   ;;  %v3081_v30 = vld [vmem:[#allocation20 + $0x8] sm:$0xff]   ;;  %v2633_v40 = vld [vmem:[%s4448_s12] sm:$0xf]   ;;  %904 = vst.msk [vmem:[#allocation4] sm:$0xff] %vm901_vm4, %v3753_v0  ;;  %3056 = vset.pattern.permute.xlu1 %v3759_v58  ;;  %3057 = vset.pattern.permute.xlu0 %v3759_v58  ;;  %vm1317_vm6 = vcmask 15368  }
 0x23f   : > { %v2634_v41 = vunpack.c.0.s8 %v2633_v40  ;;  %v2635_v42 = vunpack.c.1.s8 %v2633_v40  ;;  %905 = vst.msk [vmem:[#allocation4 + $0x8] sm:$0xff] %vm901_vm4, %v3753_v0  ;;  %vm1494_vm7 = vcmask 23568   ;;  %vm1670_vm8 = vcmask 31768   ;;  %s3763_s21 = smov 8   ;;  %s3764_s14 = smov 16  }
 0x240   : > { %2683 = vmatpush3.bf16.msra.mxu0 %v3078_v3  ;;  %2691 = vmatpush3.bf16.msra.mxu1 %v3079_v4  ;;  %s3765_s5 = smov 24   ;;  %vm1792_vm9 = vcmask 1043456   ;;  %vm1392_vm10 = vcmask 130112   ;;  %vm1568_vm11 = vcmask 195712   ;;  %vm1744_vm12 = vcmask 261312   ;;  %s5002_s24 = sld [smem:[#allocation52_spill]] }
 0x241   : > { %2696 = vmatprep.subr.bf16.mxu0 %v3753_v0  ;;  %2704 = vmatprep.subr.bf16.mxu1 %v3753_v0  ;;  %v1049_v43 = vcvt.s32.f32 %v2634_v41  ;;  %v1050_v44 = vcvt.s32.f32 %v2635_v42  ;;  %vm2152_vm13 = vcmask 523264   ;;  %s820_s30 = scalar_lea.vmem [#allocation34], %s2566_s11  ;;  %s5003_s16 = sld [smem:[#allocation71_spill]] }
 0x242   : > { %s2273_s11 = scalar_lea.sflag [#allocation10], %s4426_s19  ;;  %p5004_p6 = scmp.ne.s32.totalorder %s4975_s3, 0 }
 0x243   : > { %2685 = vmatmul.mubr.msk.bf16.vlgmr.msra.gmra.mrb[0].mxu0 %vm854_vm0, %v830_v8  ;;  %2693 = vmatmul.mubr.msk.bf16.vlgmr.msra.gmra.mrb[0].mxu1 %vm854_vm0, %v910_v10  ;;  %v2595_v45 = vadd.f32 -1.0, %v1049_v43  ;;  %v2596_v46 = vadd.f32 -1.0, %v1050_v44  ;;  %s3766_s23 = smov [#allocation34]  }
 0x244   : > { %2700 = vmatprep.mubr.msk.bf16.mxu0 %vm3754_vm1, %v3753_v0  ;;  %2706 = vmatprep.mubr.msk.bf16.mxu1 %vm3754_vm1, %v3753_v0  ;;  %s3588_s12 = sshll.u32 %s3766_s23, 4  ;;  %s3589_s12 = int_to_ptr.vmem [resolvable:$false] %s3588_s12 }
 0x245   : > { %2697 = vmatpush3.bf16.msra.mxu0 %v3080_v29  ;;  %v1053_v47 = vmul.f32 1e+09, %v2595_v45  ;;  %v1054_v48 = vmul.f32 1e+09, %v2596_v46 }
 0x246   : > { %2698 = vmatprep.subr.bf16.mxu0 %v3753_v0  ;;  %s2631_s2 = sshll.u32 %s5002_s24, 8 }
 0x247   : > { %s4805_s7 = scalar_lea.hbm %s5003_s16, %s2631_s2 }
 0x249   : > { %2699 = vmatpush3.bf16.msra.mxu0 %v3081_v30 }
 0x24a   : > { %2710 = vmatprep.subr.bf16.mxu0 %v3753_v0 }
 0x24c   : > { %2701 = vmatmul.mubr.msk.bf16.vlgmr.msra.gmra.mrb[4].mxu0 %vm854_vm0, %v910_v10 }
 0x24d   : > { %2712 = vmatprep.mubr.msk.bf16.mxu0 %vm3754_vm1, %v3753_v0 }
 0x316   : > { %v892_v12 = vpop.f32.mrb[0].mxu0  ;;  %v972_v14 = vpop.f32.mrb[0].mxu1 }
 0x317   : > { %v2686_v15 = vpop.f32.mrb[1].mxu0  ;;  %v2694_v16 = vpop.f32.mrb[1].mxu1  ;;  %v893_v18 = vadd.f32 %v2583_v11, %v892_v12  ;;  %v973_v22 = vadd.f32 %v2587_v13, %v972_v14 }
 0x318   : > { %v895_v17 = vpop.f32.mrb[2].mxu0  ;;  %v975_v20 = vpop.f32.mrb[2].mxu1 }
 0x319   : > { %v896_v19 = vadd.f32 %v2583_v11, %v895_v17  ;;  %v2687_v21 = vpop.f32.mrb[3].mxu0  ;;  %v976_v23 = vadd.f32 %v2587_v13, %v975_v20  ;;  %v2695_v24 = vpop.f32.mrb[3].mxu1 }
 0x31a   : > { %v4577_v21 = vld [vmem:[#allocation3] sm:$0xff] }
 0x31b   : > { %v899_v25 = vpack.c.bf16 %v896_v19, %v893_v18  ;;  %v979_v26 = vpack.c.bf16 %v976_v23, %v973_v22  ;;  %v2591_v23 = vld [vmem:[#allocation22] ss:$0 sm:$0xff] }
 0x31d   : > { %900 = vst.msk [vmem:[#allocation2] sm:$0xff] %vm854_vm0, %v899_v25  ;;  %1399 = vrot.lane.b32.xlu1 %v979_v26, %s3755_s27  ;;  %1222 = vrot.lane.b32.xlu0 %v979_v26, %s3756_s18  ;;  %v1061_v27 = vsel %vm1056_vm2, %v979_v26, 0 }
 0x31e   : > { %2705 = vmatpush3.bf16.xpose.msra.mxu1 %v1061_v27 }
 0x31f   : > { %2716 = vmatprep.subr.bf16.mxu1 %v3753_v0  ;;  %v1037_v20 = vpop.f32.mrb[4].mxu0 }
 0x320   : > { %v2702_v22 = vpop.f32.mrb[5].mxu0  ;;  %v1038_v27 = vadd.f32 %v2591_v23, %v1037_v20 }
 0x321   : > { %v1040_v24 = vpop.f32.mrb[6].mxu0 }
 0x322   : > { %v2703_v29 = vpop.f32.mrb[7].mxu0 }
 0x324   : > { %v1055_v28 = vld [vmem:[#allocation2] sm:$0xff] }
 0x325   : > { %1397 = vrot.lane.b32.xlu1 %v1055_v28, %s3755_s27  ;;  %1219 = vrot.lane.b32.xlu0 %v1055_v28, %s3756_s18 }
 0x326   : > { %2707 = vmatmul.mubr.msk.bf16.vlgmr.msra.gmra.mrb[4].mxu1 %vm1056_vm2, %v1055_v28 }
 0x327   : > { %2718 = vmatprep.mubr.msk.bf16.mxu1 %vm3754_vm1, %v3753_v0 }
 0x329   : > { %1573 = vrot.lane.b32.xlu1 %v1055_v28, %s3757_s6  ;;  %1575 = vrot.lane.b32.xlu0 %v979_v26, %s3757_s6  ;;  %v4579_v26 = vld [vmem:[#allocation3 + $0x8] sm:$0xff]  ;;  %v1041_v28 = vadd.f32 %v2591_v23, %v1040_v24 }
 0x38f   : > { %v1223_v31 = vpop.permute.xlu0 %1222  ;;  %v1400_v33 = vpop.permute.xlu1 %1399 }
 0x390   : > { %v1228_v32 = vsel %vm1056_vm2, %v1223_v31, 0  ;;  %v1405_v35 = vsel %vm1056_vm2, %v1400_v33, 0 }
 0x391   : > { %2717 = vmatpush3.bf16.xpose.msra.mxu1 %v1228_v32  ;;  %v4584_v32 = vpack.c.bf16 %v1041_v28, %v1038_v27 }
 0x392   : > { %2728 = vmatprep.subr.bf16.mxu1 %v3753_v0 }
 0x393   : > { %2711 = vmatpush3.bf16.msra.mxu0 %v4584_v32 }
 0x394   : > { %2722 = vmatprep.subr.bf16.mxu0 %v3753_v0 }
 0x397   : > { %v1220_v34 = vpop.permute.xlu0 %1219  ;;  %v1398_v37 = vpop.permute.xlu1 %1397 }
 0x398   : > { %2719 = vmatmul.mubr.msk.bf16.vlgmr.msra.gmra.mrb[8].mxu1 %vm1056_vm2, %v1220_v34 }
 0x399   : > { %2729 = vmatpush3.bf16.xpose.msra.mxu1 %v1405_v35  ;;  %2730 = vmatprep.mubr.msk.bf16.mxu1 %vm3754_vm1, %v3753_v0 }
 0x39a   : > { %2740 = vmatprep.subr.bf16.mxu1 %v3753_v0 }
 0x39b   : > { %v1576_v36 = vpop.permute.xlu0 %1575  ;;  %v1574_v39 = vpop.permute.xlu1 %1573 }
 0x39c   : > { %v1581_v38 = vsel %vm1056_vm2, %v1576_v36, 0  ;;  %v3760_v36 = vmov 1  }
 0x3a0   : > { %2731 = vmatmul.mubr.msk.bf16.vlgmr.msra.gmra.mrb[12].mxu1 %vm1056_vm2, %v1398_v37 }
 0x3a1   : > { %2741 = vmatpush3.bf16.xpose.msra.mxu1 %v1581_v38  ;;  %2742 = vmatprep.mubr.msk.bf16.mxu1 %vm3754_vm1, %v3753_v0 }
 0x3a2   : > { %2752 = vmatprep.subr.bf16.mxu1 %v3753_v0 }
 0x3a8   : > { %2743 = vmatmul.mubr.msk.bf16.vlgmr.msra.gmra.mrb[16].mxu1 %vm1056_vm2, %v1574_v39 }
 0x3a9   : > { %2754 = vmatprep.mubr.msk.bf16.mxu1 %vm3754_vm1, %v3753_v0 }
 0x3f9   : > { %v1097_v49 = vpop.f32.mrb[4].mxu1 }
 0x3fa   : > { %v4541_v50 = vadd.f32 %v1097_v49, %v1053_v47  ;;  %v2708_v51 = vpop.f32.mrb[5].mxu1 }
 0x3fb   : > { %v1100_v52 = vpop.f32.mrb[6].mxu1 }
 0x3fc   : > { %v4543_v53 = vadd.f32 %v1100_v52, %v1054_v48  ;;  %v2709_v54 = vpop.f32.mrb[7].mxu1  ;;  %v1107_v55 = vsel %vm1106_vm3, %v4541_v50, -inf }
 0x3fd   : > { %1108 = vmax.xlane.f32.xlu0 %v1107_v55 }
 0x3fe   : > { %v1110_v56 = vsel %vm1106_vm3, %v4543_v53, -inf }
 0x3ff   : > { %1111 = vmax.xlane.f32.xlu1 %v1110_v56 }
 0x46b   : > { %v1264_v59 = vpop.f32.mrb[8].mxu1 }
 0x46c   : > { %v4553_v60 = vadd.f32 %v1264_v59, %v1053_v47  ;;  %v2720_v61 = vpop.f32.mrb[9].mxu1 }
 0x46d   : > { %v1267_v62 = vpop.f32.mrb[10].mxu1 }
 0x46e   : > { %v4555_v63 = vadd.f32 %v1267_v62, %v1054_v48  ;;  %v2721_v1 = vpop.f32.mrb[11].mxu1  ;;  %v1273_v2 = vsel %vm1106_vm3, %v4553_v60, -inf  ;;  %v3762_v62 = vmov 3  }
 0x46f   : > { %1274 = vmax.xlane.f32.xlu0 %v1273_v2 }
 0x470   : > { %v1276_v3 = vsel %vm1106_vm3, %v4555_v63, -inf }
 0x473   : > { %1277 = vmax.xlane.f32.xlu0 %v1276_v3  ;;  %v1441_v4 = vpop.f32.mrb[12].mxu1 }
 0x474   : > { %v4561_v5 = vadd.f32 %v1441_v4, %v1053_v47  ;;  %v2732_v6 = vpop.f32.mrb[13].mxu1 }
 0x475   : > { %v1444_v7 = vpop.f32.mrb[14].mxu1 }
 0x476   : > { %v4563_v8 = vadd.f32 %v1444_v7, %v1054_v48  ;;  %v2733_v9 = vpop.f32.mrb[15].mxu1  ;;  %v1450_v10 = vsel %vm1106_vm3, %v4561_v5, -inf }
 0x477   : > { %1451 = vmax.xlane.f32.xlu1 %v1450_v10 }
 0x478   : > { %v1453_v11 = vsel %vm1106_vm3, %v4563_v8, -inf }
 0x479   : > { %1454 = vmax.xlane.f32.xlu0 %v1453_v11 }
 0x47b   : > { %v1617_v12 = vpop.f32.mrb[16].mxu1 }
 0x47c   : > { %v4569_v13 = vadd.f32 %v1617_v12, %v1053_v47  ;;  %v2744_v14 = vpop.f32.mrb[17].mxu1 }
 0x47d   : > { %v1620_v15 = vpop.f32.mrb[18].mxu1 }
 0x47e   : > { %v4571_v16 = vadd.f32 %v1620_v15, %v1054_v48  ;;  %v2745_v17 = vpop.f32.mrb[19].mxu1  ;;  %v1626_v18 = vsel %vm1106_vm3, %v4569_v13, -inf  ;;  %v3761_v48 = vmov 2  }
 0x47f   : > { %1627 = vmax.xlane.f32.xlu1 %v1626_v18 }
 0x480   : > { %v1629_v19 = vsel %vm1106_vm3, %v4571_v16, -inf }
 0x481   : > { %1630 = vmax.xlane.f32.xlu0 %v1629_v19 }
 0x48a   : > { %v1109_v25 = vpop.xlane.xlu0 %1108 }
 0x48b   : > { %v4582_v30 = vmax.f32 %v4577_v21, %v1109_v25 }
 0x48c   : > { %v1112_v31 = vpop.xlane.xlu1 %1111 }
 0x48d   : > { %v1115_v33 = vsub.f32 %v4577_v21, %v4582_v30  ;;  %1216 = vst.msk [vmem:[#allocation3] sm:$0xff] %vm1151_vm5, %v4582_v30  ;;  %v4591_v34 = vmax.f32 %v4579_v26, %v1112_v31 }
 0x48f   : > { %v1116_v35 = vsub.f32 %v4579_v26, %v4591_v34  ;;  %1217 = vst.msk [vmem:[#allocation3 + $0x8] sm:$0xff] %vm1151_vm5, %v4591_v34  ;;  %v1117_v26 = vmul.f32 1.442695, %v1115_v33 }
 0x490   : > { %1123 = vperm.xlu1 %3056, %v4582_v30  }
 0x494   : > { %3058 = vset.pattern.permute.xlu1 %v3760_v36  ;;  %v4604_v37 = vld [vmem:[#allocation3] sm:$0xff] }
 0x496   : > { %v4614_v41 = vld [vmem:[#allocation3 + $0x8] sm:$0xff] }
 0x497   : > { %1128 = vperm.xlu0 %3057, %v4591_v34  }
 0x49b   : > { %1687 = vrot.lane.b32.xlu0 %v4584_v32, %s3757_s6 }
 0x4fc   : > { %v1275_v38 = vpop.xlane.xlu0 %1274 }
 0x4fd   : > { %v4607_v39 = vmax.f32 %v4604_v37, %v1275_v38 }
 0x4ff   : > { %v1281_v40 = vsub.f32 %v4604_v37, %v4607_v39  ;;  %1395 = vst.msk [vmem:[#allocation3] sm:$0xff] %vm1317_vm6, %v4607_v39  ;;  %1289 = vperm.xlu1 %3058, %v4607_v39   ;;  %v1137_v39 = vld [vmem:[#allocation4] sm:$0xff] }
 0x500   : > { %v1278_v42 = vpop.xlane.xlu0 %1277 }
 0x501   : > { %v4617_v43 = vmax.f32 %v4614_v41, %v1278_v42 }
 0x503   : > { %v1282_v44 = vsub.f32 %v4614_v41, %v4617_v43  ;;  %1396 = vst.msk [vmem:[#allocation3 + $0x8] sm:$0xff] %vm1317_vm6, %v4617_v43  ;;  %1294 = vperm.xlu1 %3058, %v4617_v43  }
 0x504   : > { %v1452_v46 = vpop.xlane.xlu1 %1451 }
 0x506   : > { %v4624_v45 = vld [vmem:[#allocation3] sm:$0xff]  ;;  %v1455_v52 = vpop.xlane.xlu0 %1454 }
 0x507   : > { %v4627_v47 = vmax.f32 %v4624_v45, %v1452_v46  ;;  %3059 = vset.pattern.permute.xlu1 %v3761_v48 }
 0x509   : > { %v1458_v49 = vsub.f32 %v4624_v45, %v4627_v47  ;;  %1571 = vst.msk [vmem:[#allocation3] sm:$0xff] %vm1494_vm7, %v4627_v47  ;;  %1466 = vperm.xlu1 %3059, %v4627_v47  }
 0x50a   : > { %v4635_v51 = vld [vmem:[#allocation3 + $0x8] sm:$0xff] }
 0x50b   : > { %v4638_v54 = vmax.f32 %v4635_v51, %v1455_v52  ;;  %v1460_v21 = vmul.f32 1.442695, %v1458_v49 }
 0x50c   : > { %v1628_v56 = vpop.xlane.xlu1 %1627 }
 0x50d   : > { %v1459_v55 = vsub.f32 %v4635_v51, %v4638_v54  ;;  %1572 = vst.msk [vmem:[#allocation3 + $0x8] sm:$0xff] %vm1494_vm7, %v4638_v54  ;;  %1471 = vperm.xlu1 %3059, %v4638_v54  }
 0x50e   : > { %v1631_v61 = vpop.xlane.xlu0 %1630 }
 0x510   : > { %v4645_v57 = vld [vmem:[#allocation3] sm:$0xff]  ;;  %v1124_v3 = vpop.permute.xlu1 %1123 }
 0x511   : > { %v4648_v59 = vmax.f32 %v4645_v57, %v1628_v56  ;;  %1335 = vrot.lane.b32.xlu1 %v4584_v32, %s3756_s18  ;;  %v1131_v9 = vsub.f32 %v4541_v50, %v1124_v3 }
 0x512   : > { %3060 = vset.pattern.permute.xlu1 %v3762_v62 }
 0x513   : > { %v1634_v1 = vsub.f32 %v4645_v57, %v4648_v59  ;;  %1747 = vst.msk [vmem:[#allocation3] sm:$0xff] %vm1670_vm8, %v4648_v59 }
 0x514   : > { %v4657_v2 = vld [vmem:[#allocation3 + $0x8] sm:$0xff] }
 0x515   : > { %v4660_v4 = vmax.f32 %v4657_v2, %v1631_v61  ;;  %1642 = vperm.xlu1 %3060, %v4648_v59  }
 0x516   : > { %v1129_v6 = vpop.permute.xlu0 %1128 }
 0x517   : > { %v1635_v7 = vsub.f32 %v4657_v2, %v4660_v4  ;;  %1748 = vst.msk [vmem:[#allocation3 + $0x8] sm:$0xff] %vm1670_vm8, %v4660_v4  ;;  %v1132_v10 = vsub.f32 %v4543_v53, %v1129_v6 }
 0x519   : > { %v1133_v11 = vpack.c.bf16 %v1132_v10, %v1131_v9  ;;  %1647 = vperm.xlu1 %3060, %v4660_v4   ;;  %v1638_v51 = vmul.f32 1.442695, %v1635_v7 }
 0x51b   : > { %v1135_v12 = vmul.bf16 1069105081, %v1133_v11 }
 0x51d   : > { %3090 = vpow.bf16 %v1135_v12  ;;  %1511 = vrot.lane.b32.xlu1 %v4584_v32, %s3755_s27 }
 0x51e   : > { %3061 = vset.pattern.permute.xlu1 %v3759_v58 }
 0x528   : > { %v3091_v14 = vpop.eup %3090 }
 0x529   : > { %2713 = vmatmul.mubr.msk.bf16.vlgmr.msra.gmra.mrb[8].mxu0 %vm1106_vm3, %v3091_v14  ;;  %v1142_v15 = vunpack.c.h.bf16 %v3091_v14  ;;  %v1141_v53 = vunpack.c.l.bf16 %v3091_v14  ;;  %v1688_v14 = vpop.permute.xlu0 %1687 }
 0x52a   : > { %2724 = vmatprep.mubr.msk.bf16.mxu0 %vm3754_vm1, %v3753_v0 }
 0x52b   : > { %v1146_v50 = vsel %vm1106_vm3, %v1142_v15, 0.0  ;;  %v1143_v17 = vsel %vm1106_vm3, %v1141_v53, 0.0 }
 0x52c   : > { %1147 = vadd.xlane.f32.xlu0 %v1146_v50 }
 0x541   : > { %1144 = vadd.xlane.f32.xlu1 %v1143_v17 }
 0x57e   : > { %v1290_v18 = vpop.permute.xlu1 %1289 }
 0x57f   : > { %v1297_v20 = vsub.f32 %v4553_v60, %v1290_v18 }
 0x582   : > { %v1295_v19 = vpop.permute.xlu1 %1294 }
 0x583   : > { %v1298_v22 = vsub.f32 %v4555_v63, %v1295_v19 }
 0x585   : > { %v1299_v23 = vpack.c.bf16 %v1298_v22, %v1297_v20  ;;  %v1138_v20 = vld [vmem:[#allocation4 + $0x8] sm:$0xff] }
 0x587   : > { %v1301_v24 = vmul.bf16 1069105081, %v1299_v23 }
 0x588   : > { %v1467_v25 = vpop.permute.xlu1 %1466 }
 0x589   : > { %3092 = vpow.bf16 %v1301_v24  ;;  %v1474_v28 = vsub.f32 %v4561_v5, %v1467_v25  ;;  %v1285_v24 = vmul.f32 1.442695, %v1282_v44 }
 0x58c   : > { %v1472_v27 = vpop.permute.xlu1 %1471 }
 0x58d   : > { %v1475_v29 = vsub.f32 %v4563_v8, %v1472_v27 }
 0x58f   : > { %v1476_v31 = vpack.c.bf16 %v1475_v29, %v1474_v28  ;;  %v1462_v28 = vmul.f32 1.442695, %v1459_v55 }
 0x590   : > { %v1336_v32 = vpop.permute.xlu1 %1335 }
 0x591   : > { %v1478_v38 = vmul.bf16 1069105081, %v1476_v31  ;;  %2723 = vmatpush3.bf16.msra.mxu0 %v1336_v32 }
 0x592   : > { %2734 = vmatprep.subr.bf16.mxu0 %v3753_v0 }
 0x593   : > { %3094 = vpow.bf16 %v1478_v38 }
 0x594   : > { %v3093_v42 = vpop.eup %3092  ;;  %v1643_v60 = vpop.permute.xlu1 %1642 }
 0x595   : > { %2725 = vmatmul.mubr.msk.bf16.vlgmr.msra.gmra.mrb[12].mxu0 %vm1106_vm3, %v3093_v42  ;;  %v1307_v63 = vunpack.c.l.bf16 %v3093_v42  ;;  %v1308_v46 = vunpack.c.h.bf16 %v3093_v42  ;;  %v1650_v56 = vsub.f32 %v4569_v13, %v1643_v60 }
 0x596   : > { %2736 = vmatprep.mubr.msk.bf16.mxu0 %vm3754_vm1, %v3753_v0 }
 0x597   : > { %v1309_v5 = vsel %vm1106_vm3, %v1307_v63, 0.0  ;;  %v1312_v8 = vsel %vm1106_vm3, %v1308_v46, 0.0 }
 0x598   : > { %1310 = vadd.xlane.f32.xlu0 %v1309_v5  ;;  %1313 = vadd.xlane.f32.xlu1 %v1312_v8  ;;  %v1648_v52 = vpop.permute.xlu1 %1647  ;;  %v1636_v5 = vmul.f32 1.442695, %v1634_v1 }
 0x599   : > { %v1651_v61 = vsub.f32 %v4571_v16, %v1648_v52  ;;  %v1119_v16 = vmul.f32 1.442695, %v1116_v35  ;;  %v1283_v35 = vmul.f32 1.442695, %v1281_v40 }
 0x59b   : > { %v1652_v3 = vpack.c.bf16 %v1651_v61, %v1650_v56 }
 0x59c   : > { %v1512_v6 = vpop.permute.xlu1 %1511 }
 0x59d   : > { %v1654_v9 = vmul.bf16 1069105081, %v1652_v3  ;;  %2735 = vmatpush3.bf16.msra.mxu0 %v1512_v6 }
 0x59e   : > { %v3095_v10 = vpop.eup %3094  ;;  %2746 = vmatprep.subr.bf16.mxu0 %v3753_v0 }
 0x59f   : > { %3096 = vpow.bf16 %v1654_v9  ;;  %v1484_v11 = vunpack.c.l.bf16 %v3095_v10  ;;  %v1485_v12 = vunpack.c.h.bf16 %v3095_v10 }
 0x5a0   : > { %2737 = vmatmul.mubr.msk.bf16.vlgmr.msra.gmra.mrb[16].mxu0 %vm1106_vm3, %v3095_v10  ;;  %3098 = vpow2.f32 %v1119_v16 }
 0x5a1   : > { %2747 = vmatpush3.bf16.msra.mxu0 %v1688_v14  ;;  %v1486_v15 = vsel %vm1106_vm3, %v1484_v11, 0.0  ;;  %v1489_v13 = vsel %vm1106_vm3, %v1485_v12, 0.0  ;;  %2748 = vmatprep.mubr.msk.bf16.mxu0 %vm3754_vm1, %v3753_v0  ;;  %3100 = vpow2.f32 %v1117_v26  ;;  %v1155_v12 = vld [vmem:[#allocation5 + $0x8] sm:$0xff] }
 0x5a2   : > { %1487 = vadd.xlane.f32.xlu0 %v1486_v15  ;;  %1490 = vadd.xlane.f32.xlu1 %v1489_v13  ;;  %3102 = vpow2.f32 %v1283_v35 }
 0x5a3   : > { %2758 = vmatprep.subr.bf16.mxu0 %v3753_v0  ;;  %3104 = vpow2.f32 %v1285_v24 }
 0x5a4   : > { %3106 = vpow2.f32 %v1460_v21 }
 0x5a5   : > { %3108 = vpow2.f32 %v1462_v28 }
 0x5a6   : > { %3110 = vpow2.f32 %v1636_v5 }
 0x5a7   : > { %3112 = vpow2.f32 %v1638_v51 }
 0x5aa   : > { %v3097_v50 = vpop.eup %3096 }
 0x5ab   : > { %2749 = vmatmul.mubr.msk.bf16.vlgmr.msra.gmra.mrb[20].mxu0 %vm1106_vm3, %v3097_v50  ;;  %v1661_v53 = vunpack.c.h.bf16 %v3097_v50  ;;  %v1660_v17 = vunpack.c.l.bf16 %v3097_v50  ;;  %v3099_v34 = vpop.eup %3098  ;;  %v1154_v50 = vld [vmem:[#allocation5] sm:$0xff] }
 0x5ac   : > { %2760 = vmatprep.mubr.msk.bf16.mxu0 %vm3754_vm1, %v3753_v0  ;;  %v1140_v22 = vmul.f32 %v3099_v34, %v1138_v20  ;;  %v3101_v30 = vpop.eup %3100 }
 0x5ad   : > { %v1665_v18 = vsel %vm1106_vm3, %v1661_v53, 0.0  ;;  %v1662_v19 = vsel %vm1106_vm3, %v1660_v17, 0.0  ;;  %v3103_v33 = vpop.eup %3102  ;;  %v1139_v41 = vmul.f32 %v3101_v30, %v1137_v39 }
 0x5ae   : > { %1666 = vadd.xlane.f32.xlu1 %v1665_v18  ;;  %1663 = vadd.xlane.f32.xlu0 %v1662_v19  ;;  %v3105_v37 = vpop.eup %3104 }
 0x5af   : > { %v3107_v40 = vpop.eup %3106 }
 0x5b0   : > { %v3109_v54 = vpop.eup %3108 }
 0x5b1   : > { %v3111_v57 = vpop.eup %3110 }
 0x5b2   : > { %v3113_v59 = vpop.eup %3112 }
 0x5b9   : > { %v1148_v23 = vpop.xlane.xlu0 %1147 }
 0x5ba   : > { %v1150_v25 = vadd.f32 %v1148_v23, %v1140_v22 }
 0x5bc   : > { %1153 = vst.msk [vmem:[#allocation4 + $0x8] sm:$0xff] %vm1151_vm5, %v1150_v25 }
 0x5bf   : > { %1163 = vperm.xlu1 %3061, %v3099_v34  }
 0x5c3   : > { %3062 = vset.pattern.permute.xlu1 %v3760_v36  ;;  %v1304_v31 = vld [vmem:[#allocation4 + $0x8] sm:$0xff] }
 0x5c4   : > { %1324 = vperm.xlu1 %3062, %v3103_v33   ;;  %1158 = vperm.xlu0 %3057, %v3101_v30   ;;  %v1306_v38 = vmul.f32 %v3105_v37, %v1304_v31 }
 0x5c8   : > { %3063 = vset.pattern.permute.xlu0 %v3760_v36  ;;  %3065 = vset.pattern.permute.xlu1 %v3761_v48 }
 0x5c9   : > { %1329 = vperm.xlu0 %3063, %v3105_v37  }
 0x5cd   : > { %3064 = vset.pattern.permute.xlu0 %v3761_v48 }
 0x5ce   : > { %1501 = vperm.xlu0 %3064, %v3107_v40   ;;  %v1145_v43 = vpop.xlane.xlu1 %1144 }
 0x5cf   : > { %v1149_v44 = vadd.f32 %v1145_v43, %v1139_v41 }
 0x5d1   : > { %1152 = vst.msk [vmem:[#allocation4] sm:$0xff] %vm1151_vm5, %v1149_v44 }
 0x5d2   : > { %3067 = vset.pattern.permute.xlu0 %v3762_v62 }
 0x5d8   : > { %v1303_v29 = vld [vmem:[#allocation4] sm:$0xff] }
 0x5d9   : > { %v1305_v32 = vmul.f32 %v3103_v33, %v1303_v29 }
 0x5fc   : > { %v1205_v45 = vpop.f32.mrb[8].mxu0 }
 0x5fd   : > { %v2714_v47 = vpop.f32.mrb[9].mxu0 }
 0x5fe   : > { %v1208_v49 = vpop.f32.mrb[10].mxu0 }
 0x5ff   : > { %v2715_v27 = vpop.f32.mrb[11].mxu0 }
 0x625   : > { %v1311_v42 = vpop.xlane.xlu0 %1310  ;;  %v1314_v60 = vpop.xlane.xlu1 %1313 }
 0x626   : > { %v1315_v63 = vadd.f32 %v1311_v42, %v1305_v32  ;;  %v1316_v46 = vadd.f32 %v1314_v60, %v1306_v38 }
 0x628   : > { %1318 = vst.msk [vmem:[#allocation4] sm:$0xff] %vm1317_vm6, %v1315_v63  ;;  %1319 = vst.msk [vmem:[#allocation4 + $0x8] sm:$0xff] %vm1317_vm6, %v1316_v46 }
 0x62f   : > { %v1480_v55 = vld [vmem:[#allocation4] sm:$0xff]  ;;  %v1481_v8 = vld [vmem:[#allocation4 + $0x8] sm:$0xff]  ;;  %v1488_v61 = vpop.xlane.xlu0 %1487  ;;  %v1491_v3 = vpop.xlane.xlu1 %1490 }
 0x630   : > { %v1482_v52 = vmul.f32 %v3107_v40, %v1480_v55  ;;  %v1483_v56 = vmul.f32 %v3109_v54, %v1481_v8 }
 0x632   : > { %v1492_v6 = vadd.f32 %v1488_v61, %v1482_v52  ;;  %v1493_v9 = vadd.f32 %v1491_v3, %v1483_v56 }
 0x634   : > { %1495 = vst.msk [vmem:[#allocation4] sm:$0xff] %vm1494_vm7, %v1492_v6  ;;  %1496 = vst.msk [vmem:[#allocation4 + $0x8] sm:$0xff] %vm1494_vm7, %v1493_v9 }
 0x63b   : > { %v1656_v1 = vld [vmem:[#allocation4] sm:$0xff]  ;;  %v1657_v2 = vld [vmem:[#allocation4 + $0x8] sm:$0xff]  ;;  %v1667_v4 = vpop.xlane.xlu1 %1666  ;;  %v1664_v11 = vpop.xlane.xlu0 %1663 }
 0x63c   : > { %v1658_v7 = vmul.f32 %v3111_v57, %v1656_v1  ;;  %v1659_v10 = vmul.f32 %v3113_v59, %v1657_v2 }
 0x63e   : > { %v1668_v14 = vadd.f32 %v1664_v11, %v1658_v7  ;;  %v1669_v15 = vadd.f32 %v1667_v4, %v1659_v10 }
 0x63f   : > { %v1164_v13 = vpop.permute.xlu1 %1163 }
 0x640   : > { %1671 = vst.msk [vmem:[#allocation4] sm:$0xff] %vm1670_vm8, %v1668_v14  ;;  %1672 = vst.msk [vmem:[#allocation4 + $0x8] sm:$0xff] %vm1670_vm8, %v1669_v15  ;;  %v1167_v16 = vmul.f32 %v1164_v13, %v1155_v12 }
 0x642   : > { %v1213_v53 = vadd.f32 %v1208_v49, %v1167_v16 }
 0x643   : > { %v1159_v17 = vpop.permute.xlu0 %1158  ;;  %v1325_v47 = vpop.permute.xlu1 %1324 }
 0x644   : > { %1215 = vst.msk [vmem:[#allocation5 + $0x8] sm:$0xff] %vm1056_vm2, %v1213_v53  ;;  %v1166_v18 = vmul.f32 %v1159_v17, %v1154_v50 }
 0x646   : > { %v1212_v19 = vadd.f32 %v1205_v45, %v1166_v18  ;;  %v1785_v45 = vld [vmem:[#allocation23 + $0x4] sm:$0xf] }
 0x647   : > { %v1754_v22 = vld [vmem:[#allocation4] sm:$0xff]  ;;  %v1755_v21 = vld [vmem:[#allocation4 + $0x8] sm:$0xff] }
 0x648   : > { %1214 = vst.msk [vmem:[#allocation5] sm:$0xff] %vm1056_vm2, %v1212_v19  ;;  %3114 = vrcp.f32 %v1754_v22  ;;  %v1330_v29 = vpop.permute.xlu0 %1329 }
 0x649   : > { %3116 = vrcp.f32 %v1755_v21 }
 0x64b   : > { %v1321_v27 = vld [vmem:[#allocation5 + $0x8] sm:$0xff] }
 0x64c   : > { %v1333_v31 = vmul.f32 %v1330_v29, %v1321_v27 }
 0x64d   : > { %v1502_v42 = vpop.permute.xlu0 %1501 }
 0x652   : > { %v3115_v33 = vpop.eup %3114 }
 0x653   : > { %v3117_v43 = vpop.eup %3116 }
 0x668   : > { %v1375_v26 = vpop.f32.mrb[12].mxu0 }
 0x669   : > { %1384 = vrot.lane.b32.xlu1 %v1375_v26, %s3763_s21  ;;  %v2726_v34 = vpop.f32.mrb[13].mxu0 }
 0x66a   : > { %v1378_v35 = vpop.f32.mrb[14].mxu0 }
 0x66b   : > { %v2727_v20 = vpop.f32.mrb[15].mxu0 }
 0x66d   : > { %1386 = vrot.lane.b32.xlu1 %v1378_v35, %s3763_s21 }
 0x671   : > { %1506 = vperm.xlu1 %3065, %v3109_v54  }
 0x673   : > { %v1551_v23 = vpop.f32.mrb[16].mxu0 }
 0x674   : > { %v2738_v24 = vpop.f32.mrb[17].mxu0 }
 0x675   : > { %1560 = vrot.lane.b32.xlu1 %v1551_v23, %s3764_s14  ;;  %v1554_v25 = vpop.f32.mrb[18].mxu0  ;;  %v1959_v24 = vld [vmem:[#allocation23 + $0xc] sm:$0xf] }
 0x676   : > { %1562 = vrot.lane.b32.xlu0 %v1554_v25, %s3764_s14  ;;  %v2739_v30 = vpop.f32.mrb[19].mxu0  ;;  %3066 = vset.pattern.permute.xlu1 %v3762_v62 }
 0x679   : > { %1677 = vperm.xlu1 %3066, %v3111_v57  }
 0x67a   : > { %1682 = vperm.xlu0 %3067, %v3113_v59  }
 0x67d   : > { %3069 = vset.pattern.permute.xlu1 %v3760_v36 }
 0x67e   : > { %3068 = vset.pattern.permute.xlu0 %v3760_v36  ;;  %v1727_v37 = vpop.f32.mrb[20].mxu0  ;;  %v1773_v36 = vld [vmem:[#allocation23] sm:$0xf] }
 0x67f   : > { %1775 = vperm.xlu0 %3068, %v3115_v33   ;;  %1736 = vrot.lane.b32.xlu1 %v1727_v37, %s3765_s5  ;;  %v2750_v39 = vpop.f32.mrb[21].mxu0  ;;  %v1841_v44 = vsel %vm1792_vm9, %v1773_v36, 0  ;;  %v1895_v37 = vld [vmem:[#allocation23 + $0x8] sm:$0xf]  ;;  %v3083_v36 = vld [vmem:[#allocation26] sm:$0xff]  }
 0x680   : > { %v1730_v40 = vpop.f32.mrb[22].mxu0  ;;  %2759 = vmatpush3.bf16.msra.mxu0 %v1841_v44  ;;  %v1903_v39 = vsel %vm1792_vm9, %v1895_v37, 0  ;;  %v3082_v44 = vld [vmem:[#allocation28] sm:$0xff]  }
 0x681   : > { %v2751_v41 = vpop.f32.mrb[23].mxu0  ;;  %2770 = vmatprep.subr.bf16.mxu0 %v3753_v0 }
 0x683   : > { %3071 = vset.pattern.permute.xlu0 %v3761_v48  ;;  %1738 = vrot.lane.b32.xlu1 %v1730_v40, %s3765_s5 }
 0x684   : > { %1889 = vperm.xlu0 %3071, %v3117_v43  }
 0x687   : > { %1779 = vperm.xlu1 %3069, %v3117_v43  }
 0x688   : > { %3073 = vset.pattern.permute.xlu0 %v3759_v58 }
 0x689   : > { %1762 = vperm.xlu0 %3073, %v3115_v33  }
 0x68b   : > { %3070 = vset.pattern.permute.xlu1 %v3761_v48  ;;  %v1794_v48 = vsel %vm1792_vm9, %v1785_v45, 0  ;;  %v3085_v45 = vld [vmem:[#allocation26 + $0x8] sm:$0xff]  }
 0x68c   : > { %1885 = vperm.xlu1 %3070, %v3115_v33   ;;  %2753 = vmatpush3.bf16.msra.mxu1 %v1794_v48  ;;  %v4778_v48 = vld [vmem:[%s4432_s8] sm:$0xff] }
 0x68d   : > { %3075 = vset.pattern.permute.xlu0 %v3762_v62  ;;  %2764 = vmatprep.subr.bf16.mxu1 %v3753_v0 }
 0x690   : > { %3072 = vset.pattern.permute.xlu1 %v3762_v62  ;;  %v1320_v62 = vld [vmem:[#allocation5] sm:$0xff] }
 0x691   : > { %1949 = vperm.xlu1 %3072, %v3115_v33   ;;  %v1332_v49 = vmul.f32 %v1325_v47, %v1320_v62  ;;  %v1967_v33 = vsel %vm1792_vm9, %v1959_v24, 0  ;;  %v4781_v47 = vld [vmem:[%s4432_s8 + $0x8] sm:$0xff]  ;;  %s2286_s8 = sshll.u32 %s820_s30, 4  ;;  %s4809_s8 = int_to_ptr.vmem [resolvable:$true] %s2286_s8 }
 0x692   : > { %v3084_v62 = vld [vmem:[#allocation28 + $0x8] sm:$0xff]   ;;  %s3584_s15 = scalar_lea.vmem %s4809_s8, 256  ;;  %p3591_p1 = scmp.lt.s32.totalorder %s4809_s8, %s3589_s12 }
 0x693   : > { %p3585_p7 = scmp.ne.s32.totalorder %s4809_s8, %s3584_s15 }
 0x695   : > { %1953 = vperm.xlu1 %3072, %v3117_v43   ;;  %p3586_p8 = pnand %p3585_p7, %p5004_p6 }
 0x697   : > { %p3587_p12 = pneg %p3586_p8 }
 0x699   : > { %3074 = vset.pattern.permute.xlu1 %v3759_v58 }
 0x69a   : > { %1767 = vperm.xlu1 %3074, %v3117_v43  }
 0x6db   : > { %v1385_v58 = vpop.permute.xlu1 %1384 }
 0x6dc   : > { %v1390_v28 = vadd.f32 %v1385_v58, %v1332_v49  ;;  %v2021_v49 = vpack.c.bf16 %v4781_v47, %v4778_v48 }
 0x6de   : > { %1393 = vst.msk [vmem:[#allocation5] sm:$0xff] %vm1392_vm10, %v1390_v28 }
 0x6df   : > { %v1387_v32 = vpop.permute.xlu1 %1386 }
 0x6e0   : > { %v1391_v38 = vadd.f32 %v1387_v32, %v1333_v31 }
 0x6e2   : > { %1394 = vst.msk [vmem:[#allocation5 + $0x8] sm:$0xff] %vm1392_vm10, %v1391_v38 }
 0x6e5   : > { %v1497_v46 = vld [vmem:[#allocation5] sm:$0xff] }
 0x6e6   : > { %v1509_v55 = vmul.f32 %v1502_v42, %v1497_v46 }
 0x6e8   : > { %v1563_v51 = vpop.permute.xlu0 %1562 }
 0x6e9   : > { %v1498_v60 = vld [vmem:[#allocation5 + $0x8] sm:$0xff] }
 0x6f0   : > { %v1507_v63 = vpop.permute.xlu1 %1506 }
 0x6f1   : > { %v1510_v5 = vmul.f32 %v1507_v63, %v1498_v60 }
 0x6f3   : > { %v1567_v54 = vadd.f32 %v1563_v51, %v1510_v5 }
 0x6f4   : > { %v1561_v8 = vpop.permute.xlu1 %1560 }
 0x6f5   : > { %1570 = vst.msk [vmem:[#allocation5 + $0x8] sm:$0xff] %vm1568_vm11, %v1567_v54  ;;  %v1566_v52 = vadd.f32 %v1561_v8, %v1509_v55 }
 0x6f7   : > { %1569 = vst.msk [vmem:[#allocation5] sm:$0xff] %vm1568_vm11, %v1566_v52 }
 0x6f8   : > { %v1678_v56 = vpop.permute.xlu1 %1677 }
 0x6f9   : > { %v1683_v9 = vpop.permute.xlu0 %1682 }
 0x6fc   : > { %v1674_v61 = vld [vmem:[#allocation5 + $0x8] sm:$0xff]  ;;  %v1737_v3 = vpop.permute.xlu1 %1736 }
 0x6fd   : > { %v1686_v59 = vmul.f32 %v1683_v9, %v1674_v61 }
 0x6fe   : > { %v1673_v6 = vld [vmem:[#allocation5] sm:$0xff]  ;;  %v1776_v7 = vpop.permute.xlu0 %1775 }
 0x6ff   : > { %v1685_v57 = vmul.f32 %v1678_v56, %v1673_v6 }
 0x700   : > { %v1739_v1 = vpop.permute.xlu1 %1738 }
 0x701   : > { %v1742_v2 = vadd.f32 %v1737_v3, %v1685_v57  ;;  %v1743_v4 = vadd.f32 %v1739_v1, %v1686_v59  ;;  %v2609_v3 = vld [vmem:[#allocation25] ss:$0 sm:$0xff] }
 0x703   : > { %1745 = vst.msk [vmem:[#allocation5] sm:$0xff] %vm1744_vm12, %v1742_v2  ;;  %1746 = vst.msk [vmem:[#allocation5 + $0x8] sm:$0xff] %vm1744_vm12, %v1743_v4  ;;  %v1890_v12 = vpop.permute.xlu0 %1889 }
 0x706   : > { %v1780_v10 = vpop.permute.xlu1 %1779 }
 0x708   : > { %v1763_v22 = vpop.permute.xlu0 %1762 }
 0x70a   : > { %v1758_v11 = vld [vmem:[#allocation5] sm:$0xff]  ;;  %v1759_v14 = vld [vmem:[#allocation5 + $0x8] sm:$0xff] }
 0x70b   : > { %v1782_v15 = vmul.f32 %v1776_v7, %v1758_v11  ;;  %v1893_v13 = vmul.f32 %v1890_v12, %v1759_v14  ;;  %v1783_v16 = vmul.f32 %v1780_v10, %v1759_v14  ;;  %v1886_v50 = vpop.permute.xlu1 %1885  ;;  %v1770_v25 = vmul.f32 %v1763_v22, %v1758_v11  ;;  %v3086_v12 = vld [vmem:[#allocation31] sm:$0xff]  }
 0x70c   : > { %v1892_v53 = vmul.f32 %v1886_v50, %v1758_v11  ;;  %v2616_v50 = vld [vmem:[#allocation29] ss:$0 sm:$0xff] }
 0x70d   : > { %v1784_v17 = vpack.c.bf16 %v1783_v16, %v1782_v15  ;;  %v3088_v15 = vld [vmem:[#allocation31 + $0x10] sm:$0xff]  }
 0x70e   : > { %v1894_v18 = vpack.c.bf16 %v1893_v13, %v1892_v53  ;;  %v3089_v13 = vld [vmem:[#allocation31 + $0x18] sm:$0xff]  }
 0x70f   : > { %1787 = vrot.lane.b32.xlu1 %v1784_v17, %s3756_s18 }
 0x710   : > { %1897 = vrot.lane.b32.xlu0 %v1894_v18, %s3755_s27  ;;  %v1950_v19 = vpop.permute.xlu1 %1949  ;;  %s3590_s27 = scalar_lea.vmem %s3589_s12, 512 }
 0x711   : > { %v1956_v34 = vmul.f32 %v1950_v19, %v1758_v11  ;;  %p3592_p2 = scmp.lt.s32.totalorder %s3590_s27, %s3584_s15 }
 0x713   : > { %p3593_p3 = por %p3592_p2, %p3591_p1 }
 0x714   : > { %v1954_v26 = vpop.permute.xlu1 %1953 }
 0x715   : > { %v1957_v35 = vmul.f32 %v1954_v26, %v1759_v14  ;;  %p3594_p0 = pnand %p3593_p3, %p3587_p12 }
 0x717   : > { %v1958_v20 = vpack.c.bf16 %v1957_v35, %v1956_v34 }
 0x719   : > { %1961 = vrot.lane.b32.xlu1 %v1958_v20, %s3757_s6  ;;  %v1768_v23 = vpop.permute.xlu1 %1767 }
 0x71a   : > { %v1771_v21 = vmul.f32 %v1768_v23, %v1759_v14  ;;  %v3087_v14 = vld [vmem:[#allocation31 + $0x8] sm:$0xff]  }
 0x71c   : > { %v1772_v30 = vpack.c.bf16 %v1771_v21, %v1770_v25 }
 0x71e   : > { %2761 = vmatmul.mubr.msk.bf16.vlgmr.msra.gmra.mrb[24].mxu0 %vm1056_vm2, %v1772_v30 }
 0x71f   : > { %2771 = vmatpush3.bf16.msra.mxu0 %v1967_v33  ;;  %2772 = vmatprep.mubr.msk.bf16.mxu0 %vm3754_vm1, %v3753_v0 }
 0x720   : > { %2784 = vmatprep.subr.bf16.mxu0 %v3753_v0 }
 0x781   : > { %v1788_v40 = vpop.permute.xlu1 %1787 }
 0x782   : > { %2755 = vmatmul.mubr.msk.bf16.vlgmr.msra.gmra.mrb[20].mxu1 %vm1056_vm2, %v1788_v40  ;;  %v1898_v41 = vpop.permute.xlu0 %1897 }
 0x783   : > { %2765 = vmatpush3.bf16.msra.mxu1 %v1903_v39  ;;  %2766 = vmatprep.mubr.msk.bf16.mxu1 %vm3754_vm1, %v3753_v0 }
 0x784   : > { %2776 = vmatprep.subr.bf16.mxu1 %v3753_v0 }
 0x78a   : > { %2767 = vmatmul.mubr.msk.bf16.vlgmr.msra.gmra.mrb[24].mxu1 %vm1056_vm2, %v1898_v41 }
 0x78b   : > { %v1962_v43 = vpop.permute.xlu1 %1961  ;;  %2780 = vmatprep.mubr.msk.bf16.mxu1 %vm3754_vm1, %v3753_v0  ;;  %2777 = vmatpush3.bf16.msra.mxu1 %v3082_v44 }
 0x78c   : > { %2773 = vmatmul.mubr.msk.bf16.vlgmr.msra.gmra.mrb[28].mxu0 %vm1056_vm2, %v1962_v43  ;;  %2778 = vmatprep.subr.bf16.mxu1 %v3753_v0 }
 0x78d   : > { %2788 = vmatprep.mubr.msk.bf16.mxu0 %vm3754_vm1, %v3753_v0  ;;  %2785 = vmatpush3.bf16.msra.mxu0 %v3083_v36 }
 0x78e   : > { %2786 = vmatprep.subr.bf16.mxu0 %v3753_v0 }
 0x78f   : > { %2779 = vmatpush3.bf16.msra.mxu1 %v3084_v62 }
 0x790   : > { %2792 = vmatprep.subr.bf16.mxu1 %v3753_v0 }
 0x791   : > { %2787 = vmatpush3.bf16.msra.mxu0 %v3085_v45 }
 0x794   : > { %2789 = vmatmul.mubr.msk.bf16.vlgmr.msra.gmra.mrb[32].mxu0 %vm854_vm0, %v2021_v49 }
 0x7f1   : > { %v1877_v27 = vpop.f32.mrb[24].mxu0 }
 0x7f2   : > { %v2762_v58 = vpop.f32.mrb[25].mxu0 }
 0x7f3   : > { %v1880_v28 = vpop.f32.mrb[26].mxu0 }
 0x7f4   : > { %v2763_v29 = vpop.f32.mrb[27].mxu0 }
 0x855   : > { %v1830_v31 = vpop.f32.mrb[20].mxu1 }
 0x856   : > { %v1878_v32 = vadd.f32 %v1877_v27, %v1830_v31  ;;  %v2756_v38 = vpop.f32.mrb[21].mxu1 }
 0x857   : > { %v1833_v42 = vpop.f32.mrb[22].mxu1 }
 0x858   : > { %v1881_v60 = vadd.f32 %v1880_v28, %v1833_v42  ;;  %v2757_v63 = vpop.f32.mrb[23].mxu1 }
 0x85d   : > { %v1939_v46 = vpop.f32.mrb[24].mxu1 }
 0x85e   : > { %v1946_v5 = vadd.f32 %v1939_v46, %v1878_v32  ;;  %v2768_v51 = vpop.f32.mrb[25].mxu1 }
 0x85f   : > { %v1942_v54 = vpop.f32.mrb[26].mxu1  ;;  %v2003_v55 = vpop.f32.mrb[28].mxu0  ;;  %v2617_v51 = vld [vmem:[#allocation32] ss:$0 sm:$0xff] }
 0x860   : > { %v1947_v8 = vadd.f32 %v1942_v54, %v1881_v60  ;;  %v2010_v52 = vadd.f32 %v2003_v55, %v1946_v5  ;;  %v2769_v56 = vpop.f32.mrb[27].mxu1  ;;  %v2774_v61 = vpop.f32.mrb[29].mxu0 }
 0x861   : > { %v2006_v6 = vpop.f32.mrb[30].mxu0 }
 0x862   : > { %v2011_v9 = vadd.f32 %v2006_v6, %v1947_v8  ;;  %v2775_v57 = vpop.f32.mrb[31].mxu0  ;;  %v2019_v59 = vadd.f32 %v2609_v3, %v2010_v52 }
 0x864   : > { %v2020_v1 = vadd.f32 %v2609_v3, %v2011_v9 }
 0x866   : > { %v2026_v2 = vpack.c.bf16 %v2020_v1, %v2019_v59 }
 0x867   : > { %v2136_v4 = vpop.f32.mrb[32].mxu0 }
 0x868   : > { %2781 = vmatmul.mubr.msk.bf16.vlgmr.msra.gmra.mrb[28].mxu1 %vm854_vm0, %v2026_v2  ;;  %v2790_v7 = vpop.f32.mrb[33].mxu0 }
 0x869   : > { %2800 = vmatprep.mubr.msk.bf16.mxu1 %vm3754_vm1, %v3753_v0  ;;  %v2139_v10 = vpop.f32.mrb[34].mxu0  ;;  %2793 = vmatpush3.bf16.msra.mxu1 %v3086_v12 }
 0x86a   : > { %v2791_v11 = vpop.f32.mrb[35].mxu0  ;;  %2794 = vmatprep.subr.bf16.mxu1 %v3753_v0 }
 0x86d   : > { %2795 = vmatpush3.bf16.msra.mxu1 %v3087_v14 }
 0x86e   : > { %2796 = vmatprep.subr.bf16.mxu1 %v3753_v0 }
 0x871   : > { %2797 = vmatpush3.bf16.msra.mxu1 %v3088_v15 }
 0x872   : > { %2798 = vmatprep.subr.bf16.mxu1 %v3753_v0 }
 0x875   : > { %2799 = vmatpush3.bf16.msra.mxu1 %v3089_v13 }
 0x93b   : > { %v2080_v16 = vpop.f32.mrb[28].mxu1 }
 0x93c   : > { %v2137_v53 = vadd.f32 %v2136_v4, %v2080_v16  ;;  %v2782_v17 = vpop.f32.mrb[29].mxu1 }
 0x93d   : > { %v2083_v18 = vpop.f32.mrb[30].mxu1 }
 0x93e   : > { %v2150_v19 = vadd.f32 %v2616_v50, %v2137_v53  ;;  %v2140_v26 = vadd.f32 %v2139_v10, %v2083_v18  ;;  %v2783_v34 = vpop.f32.mrb[31].mxu1 }
 0x940   : > { %v2151_v35 = vadd.f32 %v2616_v50, %v2140_v26  ;;  %v2153_v20 = vsel %vm2152_vm13, %v2150_v19, 0.0 }
 0x942   : > { %v2154_v22 = vsel %vm2152_vm13, %v2151_v35, 0.0 }
 0x943   : > { %v2155_v23 = vadd.f32 %v2154_v22, %v2153_v20 }
 0x945   : > { %v2156_v24 = vrot.slane %v2155_v23, 4 }
 0x947   : > { %v2157_v25 = vadd.f32 %v2156_v24, %v2155_v23 }
 0x949   : > { %v2158_v0 = vrot.slane %v2157_v25, 2 }
 0x94b   : > { %v2159_v21 = vadd.f32 %v2158_v0, %v2157_v25 }
 0x94d   : > { %v2160_v30 = vrot.slane %v2159_v21, 1 }
 0x94f   : > { %v2161_v33 = vadd.f32 %v2160_v30, %v2159_v21 }
 0x951   : > { %v2163_v37 = vmul.f32 0.0625, %v2161_v33 }
 0x953   : > { %v2164_v39 = vsub.f32 %v2150_v19, %v2163_v37  ;;  %v2165_v40 = vsub.f32 %v2151_v35, %v2163_v37 }
 0x955   : > { %v2166_v41 = vmul.f32 %v2164_v39, %v2164_v39  ;;  %v2167_v43 = vmul.f32 %v2165_v40, %v2165_v40 }
 0x957   : > { %v2168_v36 = vsel %vm2152_vm13, %v2166_v41, 0.0  ;;  %v2169_v44 = vsel %vm2152_vm13, %v2167_v43, 0.0 }
 0x958   : > { %v2170_v45 = vadd.f32 %v2169_v44, %v2168_v36 }
 0x95a   : > { %v2171_v62 = vrot.slane %v2170_v45, 4 }
 0x95c   : > { %v2172_v49 = vadd.f32 %v2171_v62, %v2170_v45 }
 0x95e   : > { %v2173_v27 = vrot.slane %v2172_v49, 2 }
 0x960   : > { %v2174_v58 = vadd.f32 %v2173_v27, %v2172_v49 }
 0x962   : > { %v2175_v28 = vrot.slane %v2174_v58, 1 }
 0x964   : > { %v2176_v29 = vadd.f32 %v2175_v28, %v2174_v58 }
 0x966   : > { %v2177_v31 = vmul.f32 0.0625, %v2176_v29 }
 0x968   : > { %v2178_v32 = vadd.f32 1e-05, %v2177_v31 }
 0x96a   : > { %3118 = vrsqrt.f32 %v2178_v32 }
 0x974   : > { %v3119_v38 = vpop.eup %3118 }
 0x975   : > { %v2180_v42 = vmul.f32 %v3119_v38, %v2164_v39  ;;  %v2181_v60 = vmul.f32 %v3119_v38, %v2165_v40 }
 0x977   : > { %v2182_v63 = vmax.f32 %v2180_v42, 0.0  ;;  %v2183_v46 = vmax.f32 %v2181_v60, 0.0 }
 0x979   : > { %v2184_v5 = vpack.c.bf16 %v2183_v46, %v2182_v63 }
 0x97b   : > { %2801 = vmatmul.mubr.msk.bf16.vlgmr.msra.gmra.mrb[32].mxu1 %vm2152_vm13, %v2184_v5 }
 0xa4e   : > { %v2261_v54 = vpop.f32.mrb[32].mxu1 }
 0xa4f   : > { %v2262_v55 = vadd.f32 %v2617_v51, %v2261_v54  ;;  %v2802_v8 = vpop.f32.mrb[33].mxu1 }
 0xa50   : > { %v2264_v52 = vpop.f32.mrb[34].mxu1 }
 0xa51   : > { %v2268_v56 = vadd.f32 %v2262_v55, %v4778_v48  ;;  %v2265_v61 = vadd.f32 %v2617_v51, %v2264_v52  ;;  %v2803_v3 = vpop.f32.mrb[35].mxu1 }
 0xa53   : > { %2270 = vst.msk [vmem:[%s820_s30] sm:$0xff] %vm854_vm0, %v2268_v56  ;;  %v2269_v6 = vadd.f32 %v2265_v61, %v4781_v47 }
 0xa55   : > { %2271 = vst.msk [vmem:[%s820_s30 + $0x8] sm:$0xff] %vm854_vm0, %v2269_v6 }
 0xa56   : > { %3597 = shalt.err (!%p3594_p0)
}
 0xa57   : > { %s3598_s18 = scalar_lea.hbm %s4805_s7, 256  ;;  %s3602_s5 = scalar_lea.hbm %s5003_s16, 1024 }
 0xa58   : > { %p3599_p4 = scmp.ne.s32.totalorder %s4805_s7, %s3598_s18  ;;  %p3603_p9 = scmp.lt.u32.totalorder %s4805_s7, %s5003_s16 }
 0xa59   : > { %p3604_p10 = scmp.lt.u32.totalorder %s3602_s5, %s3598_s18  ;;  %p3606_p7 = scmp.lt.u32.totalorder %s3598_s18, %s4805_s7 }
 0xa5a   : > { %p3600_p5 = pnand %p3599_p4, %p5004_p6 }
 0xa5b   : > { %p3605_p13 = por %p3604_p10, %p3603_p9 }
 0xa5c   : > { %p3601_p11 = pneg %p3600_p5 }
 0xa5d   : > { %p3607_p8 = por %p3606_p7, %p3605_p13 }
 0xa5f   : > { %p3608_p12 = pnand %p3607_p8, %p3601_p11 }
 0xa61   : > { %3611 = shalt.err (!%p3608_p12)
}
 0xa62   : > { %s3767_s30 = smov 128  }
 0xa63   : > { %2864 = dma.vmem_to_hbm [thread:$0]  (%p5004_p6), %s4809_s8, 256, %s4805_s7, %s2273_s11, %s3767_s30, %s3767_s30, %s3763_s21  }
 0xa64 PF: > { %s5005_s9 = sld [smem:[#allocation49_spill]]  ;;  %p2949_p1 = scmp.ge.s32.totalorder %s3728_s26, 2 }
 0xa65   : > { %p5006_p2 = scmp.ne.s32.totalorder %s4976_s17, 0 }
 0xa67   : > { %p2919_p3 = pnand %p2949_p1, %p5006_p2 }
 0xa6a   : > { %s2301_s13 = sand.u32 1, %s5005_s9  }
 0xa6b   : > { %s2302_s15 = scalar_lea.sflag [#allocation10], %s2301_s13 }
 0xa6c   : > { %3691 = dma.done.wait (!%p2919_p3), %s2302_s15, 256  }
 0xa6d   : > { %3693 = vsyncadd (!%p2919_p3), %s2302_s15, 4294967040  ;;  %s47_s26 = sadd.s32 1, %s3728_s26   ;;  %s5007_s21 = sld [smem:[#allocation50_spill]] }
 0xa6e   : > { %p44_p0 = scmp.ge.s32.totalorder %s47_s26, 6   ;;  %s5008_s19 = sld [smem:[#allocation51_spill]] }
 0xa6f   : > { %s5009_s3 = smov %s3700_s1  ;;  %s5010_s1 = smov %s3704_s20 }
 0xa70   : > { %s5011_s20 = smov %s4118_s22  ;;  %s5013_s23 = smov %s4320_s0 }
 0xa71   : > { %s5014_s24 = smov %s3724_s25  ;;  %s5015_s25 = smov %s5017_s4 }
 0xa72   :  { %46 = sbr.rel (!%p44_p0) target bundleno = 42 (0x2a), region = 213 }
 0xa74   : > { %s5012_s22 = smov %s5008_s19 }
 0xa79   :  { %2307 = vsyncpa [#allocation9], 1 }
 0xa7a   :  { %2309 = vsyncpa [#allocation9 + $0x1], 1 }
 0xa7b   :  { %2310 = vsyncpa [#allocation12], 1 }
 0xa7c   :  { %2312 = vsyncpa [#allocation12 + $0x1], 1 }
 0xa7d   :  { %2313 = vsyncpa [#allocation15], 1 }
 0xa7e   :  { %2314 = vsyncpa [#allocation18], 1 }
 0xa7f   :  { %2315 = vsyncpa [#allocation21], 1 }
 0xa80   :  { %2316 = vsyncpa [#allocation24], 1 }
 0xa81   :  { %2317 = vsyncpa [#allocation27], 1 }
 0xa82   :  { %2318 = vsyncpa [#allocation30], 1 }
 0xa83   :  { %2319 = vsyncpa [#allocation33], 1 }
 0xa84   :  { %2320 = vsyncpa [#allocation10], 1 }
 0xa85   :  { %2322 = vsyncpa [#allocation10 + $0x1], 1 }

</bundles_post_ra>
